<compile_context>
chip_gen: v7x
topology: tpu7x:2x2x1
jax: 0.10.0
libtpu: 0.0.40
codegen_flags: <defaults>
</compile_context>

<pallas_src>
import functools

import jax
import jax.numpy as jnp
from jax.experimental import pallas as pl
from jax.experimental.pallas import tpu as pltpu


def _round_up(x, m):
    return ((x + m - 1) // m) * m


def _pad2(a, rows, cols, dtype):
    a = a.astype(dtype)
    return jnp.pad(a, ((0, rows - a.shape[0]), (0, cols - a.shape[1])))


@functools.lru_cache(maxsize=None)
def _buffered_supported():
    """Probe once whether BlockSpec(pipeline_mode=pl.Buffered(1)) lowers on TPU."""
    if not hasattr(pl, "Buffered"):
        return False

    def _probe(x_ref, o_ref):
        o_ref[...] = x_ref[...]

    try:
        spec = pl.BlockSpec((8, 128), lambda i: (0, 0),
                            pipeline_mode=pl.Buffered(1))
        fn = pl.pallas_call(
            _probe, grid=(1,),
            in_specs=[spec],
            out_specs=pl.BlockSpec((8, 128), lambda i: (0, 0)),
            out_shape=jax.ShapeDtypeStruct((8, 128), jnp.float32))
        jax.block_until_ready(fn(jnp.zeros((8, 128), jnp.float32)))
        return True
    except Exception:
        return False


def _resident_spec(shape):
    """Whole array, same block every grid step -> fetched once, stays resident.

    Constant block index means the second pipeline buffer is wasted VMEM, so
    request single-buffering when the running JAX supports pipeline_mode.
    """
    idx = lambda i: (0, 0)
    if _buffered_supported():
        return pl.BlockSpec(shape, idx, pipeline_mode=pl.Buffered(1))
    return pl.BlockSpec(shape, idx)


def _vmem_limit_bytes():
    """Generation-aware scoped-VMEM limit (~3/4 of physical, capped at 100 MiB)."""
    cap = None
    try:
        cap = int(pltpu.get_tpu_info().vmem_capacity_bytes)
    except Exception:
        cap = None
    if not cap or cap <= 0:
        cap = 64 << 20          # conservative: smallest current generation (v7x)
    return int(min(cap * 3 // 4, 100 << 20))


# ----------------------------------------------------------------------------
# Fused single-call path (adj fully resident, read from HBM exactly once).
# ----------------------------------------------------------------------------
def _fused_kernel(adj_ref, x_ref, w01_ref, res_w_ref, res_b_ref, w_heads_ref,
                  mulv_ref, hidden_ref, *, fout_p, compute_dtype, reassociate):
    adj = adj_ref[...]
    x = x_ref[...]
    ax = jnp.dot(adj, x, preferred_element_type=jnp.float32)
    h01 = jnp.dot(ax.astype(compute_dtype), w01_ref[...],
                  preferred_element_type=jnp.float32)
    residual = jnp.dot(x, res_w_ref[...],
                       preferred_element_type=jnp.float32) + res_b_ref[...]
    part = h01[:, :fout_p] + residual
    hop0s = h01[:, fout_p:].astype(compute_dtype)
    hop1s = jnp.dot(adj, hop0s, preferred_element_type=jnp.float32)
    hidden = jnp.maximum(part + hop1s, 0.0)
    hidden_ref[...] = hidden
    hc = hidden.astype(compute_dtype)
    if reassociate:
        ah = jnp.dot(adj, hc, preferred_element_type=jnp.float32)
        mulv_ref[...] = jnp.dot(ah.astype(compute_dtype), w_heads_ref[...],
                                preferred_element_type=jnp.float32)
    else:
        t = jnp.dot(hc, w_heads_ref[...],
                    preferred_element_type=jnp.float32).astype(compute_dtype)
        mulv_ref[...] = jnp.dot(adj, t, preferred_element_type=jnp.float32)


# ----------------------------------------------------------------------------
# Streaming pass 1 (row-local given resident x):
#   ax   = adj[rows] @ x ; h01 = ax @ [hw0*W | hw1*W]
#   residual = x[rows] @ res_w + res_b          (x[rows] sliced from resident x)
#   part  = hw0*hop0 + residual      -> output (f32)
#   hop0s = hw1*hop0                 -> output (compute dtype, feeds pass 2)
# ----------------------------------------------------------------------------
def _pass1_kernel(adj_ref, x_ref, w01_ref, res_w_ref, res_b_ref,
                  part_ref, hop0s_ref, *, fout_p, tm):
    ax = jnp.dot(adj_ref[...], x_ref[...], preferred_element_type=jnp.float32)
    h01 = jnp.dot(ax.astype(w01_ref.dtype), w01_ref[...],
                  preferred_element_type=jnp.float32)
    r0 = pl.multiple_of(pl.program_id(0) * tm, tm)
    xr = x_ref[pl.ds(r0, tm), :]            # row block of the resident x (free)
    residual = jnp.dot(xr, res_w_ref[...],
                       preferred_element_type=jnp.float32) + res_b_ref[...]
    part_ref[...] = h01[:, :fout_p] + residual
    hop0s_ref[...] = h01[:, fout_p:].astype(hop0s_ref.dtype)


# ----------------------------------------------------------------------------
# Streaming pass 2 (needs the complete hop0s):
#   hidden = relu(part + adj[rows] @ hop0s)     -> output (f32)
#   rhs    = hidden (reassociated)  or  hidden @ [w_mu|w_lv]   -> feeds pass 3
# ----------------------------------------------------------------------------
def _pass2_kernel(adj_ref, hop0s_ref, part_ref, w_heads_ref,
                  hidden_ref, rhs_ref, *, project):
    hop1s = jnp.dot(adj_ref[...], hop0s_ref[...],
                    preferred_element_type=jnp.float32)
    hidden = jnp.maximum(part_ref[...] + hop1s, 0.0)
    hidden_ref[...] = hidden
    if project:
        rhs = jnp.dot(hidden.astype(w_heads_ref.dtype), w_heads_ref[...],
                      preferred_element_type=jnp.float32)
    else:
        rhs = hidden
    rhs_ref[...] = rhs.astype(rhs_ref.dtype)


# ----------------------------------------------------------------------------
# Streaming pass 3 (needs the complete rhs):
#   reassociated: [mu|logvar] = (adj[rows] @ hidden) @ [w_mu|w_lv]
#   otherwise   : [mu|logvar] =  adj[rows] @ t
# ----------------------------------------------------------------------------
def _pass3_kernel(adj_ref, rhs_ref, w_heads_ref, mulv_ref, *, project):
    acc = jnp.dot(adj_ref[...], rhs_ref[...], preferred_element_type=jnp.float32)
    if project:
        acc = jnp.dot(acc.astype(w_heads_ref.dtype), w_heads_ref[...],
                      preferred_element_type=jnp.float32)
    mulv_ref[...] = acc


# ----------------------------------------------------------------------------
# Wrapper
# ----------------------------------------------------------------------------
def hdvae_block(x, adj, params, *, block_rows=256, compute_dtype=jnp.bfloat16,
                force_streaming=False):
    n, fin = x.shape
    fout = params["w_mh"].shape[1]
    g = params["w_mu"].shape[1]
    f32 = jnp.float32
    bpe = int(jnp.dtype(compute_dtype).itemsize)

    # Lane-dense padded sizes (last dims multiples of 128).
    fin_p = _round_up(fin, 128)
    fout_p = _round_up(fout, 128)
    g_p = _round_up(g, 128)
    n_p = _round_up(n, 128)

    # Pass-3 association: shrink the N^2 matmul to the narrower width.
    reassociate = fout_p <= 2 * g_p
    rhs_w = fout_p if reassociate else 2 * g_p

    # Hop softmax on 2 scalars in the wrapper; fold into the multi-hop weight.
    hw = jax.nn.softmax(params["hop_logits"].reshape(-1).astype(f32))
    w_mh = _pad2(params["w_mh"], fin_p, fout_p, f32)
    w01 = jnp.concatenate([hw[0] * w_mh, hw[1] * w_mh], axis=1).astype(compute_dtype)
    res_w = _pad2(params["res_w"], fin_p, fout_p, compute_dtype)
    res_b = _pad2(params["res_b"].reshape(1, -1), 1, fout_p, f32)
    w_heads = jnp.concatenate(
        [_pad2(params["w_mu"], fout_p, g_p, compute_dtype),
         _pad2(params["w_lv"], fout_p, g_p, compute_dtype)], axis=1)

    x_p = _pad2(x, n_p, fin_p, compute_dtype)
    adj_p = _pad2(adj, n_p, n_p, compute_dtype)

    vmem_limit = _vmem_limit_bytes()
    weight_bytes = (fin_p * 3 * fout_p + fout_p * 2 * g_p) * bpe + 4 * fout_p

    # ---------------- fused path (adj resident, read once) ----------------
    fused_bytes = (n_p * n_p * bpe                       # adj resident
                   + n_p * fin_p * (bpe + 4)             # x + ax temp
                   + weight_bytes
                   + n_p * 2 * fout_p * 4 * 2            # h01 / part / hop temps
                   + n_p * fout_p * 4 * 2                # hidden (+ narrow copy)
                   + n_p * 2 * g_p * 4)                  # mulv
    use_fused = (not force_streaming) and fused_bytes <= int(vmem_limit * 0.7)

    if use_fused:
        mulv, hidden_p = pl.pallas_call(
            functools.partial(_fused_kernel, fout_p=fout_p,
                              compute_dtype=compute_dtype,
                              reassociate=reassociate),
            out_shape=(jax.ShapeDtypeStruct((n_p, 2 * g_p), f32),
                       jax.ShapeDtypeStruct((n_p, fout_p), f32)),
            compiler_params=pltpu.CompilerParams(vmem_limit_bytes=vmem_limit),
        )(adj_p, x_p, w01, res_w, res_b, w_heads)
    else:
        # ---------------- streaming 3-pass path ----------------
        # Budget the adjacency row tile against the scoped VMEM limit.
        resident_bytes = (max(n_p * fin_p, n_p * fout_p, n_p * rhs_w) * bpe
                          + weight_bytes)
        adj_budget = max(vmem_limit - resident_bytes - (4 << 20),
                         2 * 8 * n_p * bpe)
        tm = 8
        for t in (512, 256, 128, 64, 32, 16, 8):
            if t <= max(8, block_rows) and n_p % t == 0 \
                    and 2 * t * n_p * bpe <= adj_budget:
                tm = t
                break
        # Keep >= 2 row blocks so the "parallel" axis can shard across 2 TCs (v7x).
        if n_p // tm == 1 and tm > 128:
            tm //= 2
        grid = (n_p // tm,)

        adj_spec = pl.BlockSpec((tm, n_p), lambda i: (i, 0))     # streamed rows
        row_fo = pl.BlockSpec((tm, fout_p), lambda i: (i, 0))
        row_rhs = pl.BlockSpec((tm, rhs_w), lambda i: (i, 0))
        row_2g = pl.BlockSpec((tm, 2 * g_p), lambda i: (i, 0))
        cparams = pltpu.CompilerParams(dimension_semantics=("parallel",),
                                       vmem_limit_bytes=vmem_limit)

        # ---------------- pass 1 ----------------
        cost1 = pl.CostEstimate(
            flops=2 * n_p * n_p * fin_p + 2 * n_p * fin_p * 3 * fout_p,
            transcendentals=0,
            bytes_accessed=bpe * (n_p * n_p + n_p * fin_p + 3 * fin_p * fout_p)
            + 4 * (n_p * fout_p + fout_p) + bpe * n_p * fout_p)
        part, hop0s = pl.pallas_call(
            functools.partial(_pass1_kernel, fout_p=fout_p, tm=tm),
            grid=grid,
            in_specs=[adj_spec,
                      _resident_spec((n_p, fin_p)),          # x (resident)
                      _resident_spec((fin_p, 2 * fout_p)),   # [hw0*W | hw1*W]
                      _resident_spec((fin_p, fout_p)),       # res_w
                      _resident_spec((1, fout_p))],          # res_b
            out_specs=(row_fo, row_fo),
            out_shape=(jax.ShapeDtypeStruct((n_p, fout_p), f32),
                       jax.ShapeDtypeStruct((n_p, fout_p), compute_dtype)),
            compiler_params=cparams,
            cost_estimate=cost1,
        )(adj_p, x_p, w01, res_w, res_b)

        # ---------------- pass 2 ----------------
        cost2 = pl.CostEstimate(
            flops=2 * n_p * n_p * fout_p
            + (0 if reassociate else 2 * n_p * fout_p * 2 * g_p),
            transcendentals=0,
            bytes_accessed=bpe * (n_p * n_p + n_p * fout_p + fout_p * 2 * g_p)
            + 4 * 2 * n_p * fout_p + bpe * n_p * rhs_w)
        hidden_p, rhs = pl.pallas_call(
            functools.partial(_pass2_kernel, project=not reassociate),
            grid=grid,
            in_specs=[adj_spec,
                      _resident_spec((n_p, fout_p)),         # hw1*hop0 (resident)
                      row_fo,                                # part row block
                      _resident_spec((fout_p, 2 * g_p))],    # [w_mu | w_lv]
            out_specs=(row_fo, row_rhs),
            out_shape=(jax.ShapeDtypeStruct((n_p, fout_p), f32),
                       jax.ShapeDtypeStruct((n_p, rhs_w), compute_dtype)),
            compiler_params=cparams,
            cost_estimate=cost2,
        )(adj_p, hop0s, part, w_heads)

        # ---------------- pass 3 ----------------
        cost3 = pl.CostEstimate(
            flops=2 * n_p * n_p * rhs_w
            + (2 * n_p * rhs_w * 2 * g_p if reassociate else 0),
            transcendentals=0,
            bytes_accessed=bpe * (n_p * n_p + n_p * rhs_w + fout_p * 2 * g_p)
            + 4 * n_p * 2 * g_p)
        mulv = pl.pallas_call(
            functools.partial(_pass3_kernel, project=reassociate),
            grid=grid,
            in_specs=[adj_spec,
                      _resident_spec((n_p, rhs_w)),          # hidden or t (resident)
                      _resident_spec((fout_p, 2 * g_p))],    # [w_mu | w_lv]
            out_specs=row_2g,
            out_shape=jax.ShapeDtypeStruct((n_p, 2 * g_p), f32),
            compiler_params=cparams,
            cost_estimate=cost3,
        )(adj_p, rhs, w_heads)

    mu = mulv[:n, :g]
    logvar = mulv[:n, g_p:g_p + g]
    hidden = hidden_p[:n, :fout]
    return mu, logvar, hidden


# ----------------------------------------------------------------------------
# Deterministic parameter init (mirrors the PyTorch __init__ shapes)
# ----------------------------------------------------------------------------
def xavier_uniform(key, shape):
    fan_in, fan_out = shape
    limit = (6.0 / (fan_in + fan_out)) ** 0.5
    return jax.random.uniform(key, shape, jnp.float32, -limit, limit)


def init_params(key, in_features, out_features, gcn_out_features):
    k1, k2, k3, k4, k5 = jax.random.split(key, 5)
    return {
        # MultiHopGraphConvolution
        "w_mh": xavier_uniform(k1, (in_features, out_features)),
        "hop_logits": jnp.array([[1.2, 0.0]], dtype=jnp.float32),  # init_logits
        # res_proj = nn.Linear(in, out); weight stored pre-transposed (in, out)
        # (when in_features == out_features the module uses Identity: pass eye/0)
        "res_w": xavier_uniform(k2, (in_features, out_features)),
        "res_b": 0.1 * jax.random.normal(k5, (1, out_features), jnp.float32),
        # GraphConvolution heads
        "w_mu": xavier_uniform(k3, (out_features, gcn_out_features)),
        "w_lv": xavier_uniform(k4, (out_features, gcn_out_features)),
    }


# ----------------------------------------------------------------------------
# Pure-JAX reference (same math, for a correctness check)
# ----------------------------------------------------------------------------
def hdvae_block_ref(x, adj, p):
    residual = x @ p["res_w"] + p["res_b"]
    support = x @ p["w_mh"]
    adj2 = adj @ adj
    hw = jax.nn.softmax(p["hop_logits"].reshape(-1))
    out = hw[0] * (adj @ support) + hw[1] * (adj2 @ support) + residual
    hidden = jnp.maximum(out, 0.0)
    mu = adj @ (hidden @ p["w_mu"])
    logvar = adj @ (hidden @ p["w_lv"])
    return mu, logvar, hidden


def _make_inputs(key, n, in_f):
    kx, kadj = jax.random.split(key)
    x = jax.random.normal(kx, (n, in_f), jnp.float32)
    a = jax.random.uniform(kadj, (n, n), jnp.float32)
    a = (a + a.T) * 0.5 + jnp.eye(n, dtype=jnp.float32)
    adj = a / jnp.sum(a, axis=1, keepdims=True)
    return x, adj


if __name__ == "__main__":
    IN_F, OUT_F, GCN_OUT = 8, 16, 8
    key = jax.random.PRNGKey(0)
    kin1, kin2, kp = jax.random.split(key, 3)
    params = init_params(kp, IN_F, OUT_F, GCN_OUT)

    # Test 1: small graph -> fused single-call path (adj resident), f32, tight.
    x, adj = _make_inputs(kin1, 16, IN_F)
    mu, logvar, hidden = hdvae_block(x, adj, params, compute_dtype=jnp.float32)
    jax.block_until_ready((mu, logvar, hidden))
    mu_r, lv_r, hid_r = hdvae_block_ref(x, adj, params)
    assert mu.shape == (16, GCN_OUT) and logvar.shape == (16, GCN_OUT)
    assert hidden.shape == (16, OUT_F)
    assert jnp.allclose(mu, mu_r, atol=1e-3, rtol=1e-3)
    assert jnp.allclose(logvar, lv_r, atol=1e-3, rtol=1e-3)
    assert jnp.allclose(hidden, hid_r, atol=1e-3, rtol=1e-3)

    # Test 2: streaming 3-pass path with row tiling (grid > 1), f32, tight.
    x2, adj2 = _make_inputs(kin2, 40, IN_F)
    mu2, lv2, hid2 = hdvae_block(x2, adj2, params, block_rows=16,
                                 compute_dtype=jnp.float32, force_streaming=True)
    jax.block_until_ready((mu2, lv2, hid2))
    mu2_r, lv2_r, hid2_r = hdvae_block_ref(x2, adj2, params)
    assert jnp.allclose(mu2, mu2_r, atol=1e-3, rtol=1e-3)
    assert jnp.allclose(lv2, lv2_r, atol=1e-3, rtol=1e-3)
    assert jnp.allclose(hid2, hid2_r, atol=1e-3, rtol=1e-3)

    # Test 3: default bf16 compute dtype (bf16 MXU inputs, f32 accumulation)
    # on both the fused and the streaming path -> looser tolerance.
    mu3, lv3, hid3 = hdvae_block(x, adj, params)                    # fused, bf16
    mu4, lv4, hid4 = hdvae_block(x2, adj2, params, block_rows=16,
                                 force_streaming=True)              # streamed, bf16
    jax.block_until_ready((mu3, lv3, hid3, mu4, lv4, hid4))
    assert jnp.allclose(mu3, mu_r, atol=5e-2, rtol=5e-2)
    assert jnp.allclose(lv3, lv_r, atol=5e-2, rtol=5e-2)
    assert jnp.allclose(hid3, hid_r, atol=5e-2, rtol=5e-2)
    assert jnp.allclose(mu4, mu2_r, atol=5e-2, rtol=5e-2)
    assert jnp.allclose(lv4, lv2_r, atol=5e-2, rtol=5e-2)
    assert jnp.allclose(hid4, hid2_r, atol=5e-2, rtol=5e-2)

    print("KERNEL_OK")
</pallas_src>

<mosaic_0001>
module attributes {stable_mosaic.version = 11 : i64} {
  func.func @_fused_kernel(%arg0: memref<128x128xf32, #tpu.memory_space<vmem>>, %arg1: memref<128x128xf32, #tpu.memory_space<vmem>>, %arg2: memref<128x256xf32, #tpu.memory_space<vmem>>, %arg3: memref<128x128xf32, #tpu.memory_space<vmem>>, %arg4: memref<1x128xf32, #tpu.memory_space<vmem>>, %arg5: memref<128x256xf32, #tpu.memory_space<vmem>>, %arg6: memref<128x256xf32, #tpu.memory_space<vmem>>, %arg7: memref<128x128xf32, #tpu.memory_space<vmem>>) attributes {dimension_semantics = [], scalar_prefetch = 0 : i64, scratch_operands = 0 : i64, tpu.core_type = #tpu.core_type<tc>} {
    %c0 = arith.constant 0 : index
    %c0_0 = arith.constant 0 : index
    %0 = vector.load %arg0[%c0, %c0_0] : memref<128x128xf32, #tpu.memory_space<vmem>>, vector<128x128xf32>
    %c0_1 = arith.constant 0 : index
    %c0_2 = arith.constant 0 : index
    %1 = vector.load %arg1[%c0_1, %c0_2] : memref<128x128xf32, #tpu.memory_space<vmem>>, vector<128x128xf32>
    %cst = arith.constant dense<0.000000e+00> : vector<128x128xf32>
    %2 = tpu.matmul %0, %1, %cst {dimension_numbers = #tpu.dot_dimension_numbers<[1], [0], [0], [1], [0, 0, 1, 1], [], []>} : vector<128x128xf32>, vector<128x128xf32>, vector<128x128xf32> -> vector<128x128xf32>
    %c0_3 = arith.constant 0 : index
    %c0_4 = arith.constant 0 : index
    %3 = vector.load %arg2[%c0_3, %c0_4] : memref<128x256xf32, #tpu.memory_space<vmem>>, vector<128x256xf32>
    %cst_5 = arith.constant dense<0.000000e+00> : vector<128x256xf32>
    %4 = tpu.matmul %2, %3, %cst_5 {dimension_numbers = #tpu.dot_dimension_numbers<[1], [0], [0], [1], [0, 0, 1, 1], [], []>} : vector<128x128xf32>, vector<128x256xf32>, vector<128x256xf32> -> vector<128x256xf32>
    %c0_6 = arith.constant 0 : index
    %c0_7 = arith.constant 0 : index
    %5 = vector.load %arg3[%c0_6, %c0_7] : memref<128x128xf32, #tpu.memory_space<vmem>>, vector<128x128xf32>
    %cst_8 = arith.constant dense<0.000000e+00> : vector<128x128xf32>
    %6 = tpu.matmul %1, %5, %cst_8 {dimension_numbers = #tpu.dot_dimension_numbers<[1], [0], [0], [1], [0, 0, 1, 1], [], []>} : vector<128x128xf32>, vector<128x128xf32>, vector<128x128xf32> -> vector<128x128xf32>
    %c0_9 = arith.constant 0 : index
    %c0_10 = arith.constant 0 : index
    %7 = vector.load %arg4[%c0_9, %c0_10] : memref<1x128xf32, #tpu.memory_space<vmem>>, vector<1x128xf32>
    %8 = vector.broadcast %7 : vector<1x128xf32> to vector<128x128xf32>
    %9 = arith.addf %6, %8 : vector<128x128xf32>
    %10 = vector.extract_strided_slice %4 {offsets = [0, 0], sizes = [128, 128], strides = [1, 1]} : vector<128x256xf32> to vector<128x128xf32>
    %11 = arith.addf %10, %9 : vector<128x128xf32>
    %12 = vector.extract_strided_slice %4 {offsets = [0, 128], sizes = [128, 128], strides = [1, 1]} : vector<128x256xf32> to vector<128x128xf32>
    %cst_11 = arith.constant dense<0.000000e+00> : vector<128x128xf32>
    %13 = tpu.matmul %0, %12, %cst_11 {dimension_numbers = #tpu.dot_dimension_numbers<[1], [0], [0], [1], [0, 0, 1, 1], [], []>} : vector<128x128xf32>, vector<128x128xf32>, vector<128x128xf32> -> vector<128x128xf32>
    %14 = arith.addf %11, %13 : vector<128x128xf32>
    %cst_12 = arith.constant 0.000000e+00 : f32
    %15 = vector.broadcast %cst_12 : f32 to vector<128x128xf32>
    %16 = arith.maximumf %14, %15 : vector<128x128xf32>
    %c0_13 = arith.constant 0 : index
    %c0_14 = arith.constant 0 : index
    %17 = vector.load %arg7[%c0_13, %c0_14] : memref<128x128xf32, #tpu.memory_space<vmem>>, vector<128x128xf32>
    tpu.vector_store %arg7[%c0_13, %c0_14], %16 {strides = array<i32>} : memref<128x128xf32, #tpu.memory_space<vmem>>, vector<128x128xf32>,
    %cst_15 = arith.constant dense<0.000000e+00> : vector<128x128xf32>
    %18 = tpu.matmul %0, %16, %cst_15 {dimension_numbers = #tpu.dot_dimension_numbers<[1], [0], [0], [1], [0, 0, 1, 1], [], []>} : vector<128x128xf32>, vector<128x128xf32>, vector<128x128xf32> -> vector<128x128xf32>
    %c0_16 = arith.constant 0 : index
    %c0_17 = arith.constant 0 : index
    %19 = vector.load %arg5[%c0_16, %c0_17] : memref<128x256xf32, #tpu.memory_space<vmem>>, vector<128x256xf32>
    %cst_18 = arith.constant dense<0.000000e+00> : vector<128x256xf32>
    %20 = tpu.matmul %18, %19, %cst_18 {dimension_numbers = #tpu.dot_dimension_numbers<[1], [0], [0], [1], [0, 0, 1, 1], [], []>} : vector<128x128xf32>, vector<128x256xf32>, vector<128x256xf32> -> vector<128x256xf32>
    %c0_19 = arith.constant 0 : index
    %c0_20 = arith.constant 0 : index
    %21 = vector.load %arg6[%c0_19, %c0_20] : memref<128x256xf32, #tpu.memory_space<vmem>>, vector<128x256xf32>
    tpu.vector_store %arg6[%c0_19, %c0_20], %20 {strides = array<i32>} : memref<128x256xf32, #tpu.memory_space<vmem>>, vector<128x256xf32>,
    return
  }
}

</mosaic_0001>

<bundles_post_ra>
// kernel: tpu_custom_call.1
= control target key start
LH: loop header
LB: loop body
LE: loop exit
PB: predicated region body
PF: predicated region fallthrough
CT: control target
= control target key end

     0   :  { %13 = vsyncpa [#allocation3], 0  ;;  %s2395_s0 = inlined_call_operand.hbm [shape: f32[128,128], index: 0, kind: input, shape index: {}]   ;;  %s2396_s1 = inlined_call_operand.hbm [shape: f32[128,128], index: 1, kind: input, shape index: {}]   ;;  %s2397_s2 = inlined_call_operand.hbm [shape: f32[128,256], index: 2, kind: input, shape index: {}]   ;;  %s2398_s3 = inlined_call_operand.hbm [shape: f32[128,128], index: 3, kind: input, shape index: {}]   ;;  %s2399_s4 = inlined_call_operand.vmem [shape: f32[1,128], index: 4, kind: input, shape index: {}]   ;;  %s2400_s5 = inlined_call_operand.hbm [shape: f32[128,256], index: 5, kind: input, shape index: {}]   ;;  %s2401_s6 = inlined_call_operand.hbm [shape: f32[128,256], index: 6, kind: output, shape index: {0}]   ;;  %s2402_s7 = inlined_call_operand.hbm [shape: f32[128,128], index: 7, kind: output, shape index: {1}]  }
   0x1   :  { %14 = vsyncpa [#allocation6], 0 }
   0x2   :  { %15 = vsyncpa [#allocation9], 0 }
   0x3   :  { %16 = vsyncpa [#allocation4], 0 }
   0x4   :  { %17 = vsyncpa [#allocation13], 0  ;;  %s1968_s24 = smov [#allocation5]   ;;  %s1969_s26 = smov [#allocation8]  }
   0x5   :  { %s35_s25 = sshll.u32 %s1968_s24, 4  ;;  %s59_s27 = sshll.u32 %s1969_s26, 4  ;;  %s36_s25 = int_to_ptr.vmem [resolvable:$true] %s35_s25  ;;  %s2020_s27 = int_to_ptr.vmem [resolvable:$true] %s59_s27 }
   0x6   :  { %s1804_s30 = scalar_lea.hbm %s2396_s1, 2048 }
   0x7   :  { %p1805_p0 = scmp.ne.s32.totalorder %s2396_s1, %s1804_s30  ;;  %p1808_p1 = scmp.lt.u32.totalorder %s1804_s30, %s2396_s1 }
   0x9   :  { %p1810_p2 = pnand %p1808_p1, %p1805_p0 }
   0xb   :  { %1813 = shalt.err (!%p1810_p2)
}
   0xc   :  { %s1814_s12 = scalar_lea.vmem %s36_s25, 2048  ;;  %p1819_p4 = scmp.lt.s32.totalorder %s36_s25, %s36_s25 }
   0xd   :  { %p1815_p3 = scmp.ne.s32.totalorder %s36_s25, %s1814_s12  ;;  %p1820_p5 = scmp.lt.s32.totalorder %s1814_s12, %s1814_s12 }
   0xf   :  { %p1821_p6 = por %p1820_p5, %p1819_p4 }
  0x11   :  { %p1822_p7 = pnand %p1821_p6, %p1815_p3 }
  0x13   :  { %1825 = shalt.err (!%p1822_p7)
}
  0x14   :  { %s1970_s13 = smov 128   ;;  %s1971_s14 = smov 8  }
  0x15   :  { %41 = dma.hbm_to_vmem [thread:$0]  %s2396_s1, 2048, %s36_s25, [#allocation6], %s1970_s13, %s1970_s13, %s1971_s14  }
  0x16   :  { %s1826_s19 = scalar_lea.hbm %s2398_s3, 2048 }
  0x17   :  { %p1827_p8 = scmp.ne.s32.totalorder %s2398_s3, %s1826_s19  ;;  %p1830_p9 = scmp.lt.u32.totalorder %s1826_s19, %s2398_s3 }
  0x19   :  { %p1832_p10 = pnand %p1830_p9, %p1827_p8 }
  0x1b   :  { %1835 = shalt.err (!%p1832_p10)
}
  0x1c   :  { %s1836_s24 = scalar_lea.vmem %s2020_s27, 2048  ;;  %p1841_p12 = scmp.lt.s32.totalorder %s2020_s27, %s2020_s27 }
  0x1d   :  { %p1837_p11 = scmp.ne.s32.totalorder %s2020_s27, %s1836_s24  ;;  %p1842_p13 = scmp.lt.s32.totalorder %s1836_s24, %s1836_s24 }
  0x1f   :  { %p1843_p0 = por %p1842_p13, %p1841_p12 }
  0x21   :  { %p1844_p1 = pnand %p1843_p0, %p1837_p11 }
  0x23   :  { %1847 = shalt.err (!%p1844_p1)
}
  0x24   :  { %65 = dma.hbm_to_vmem [thread:$0]  %s2398_s3, 2048, %s2020_s27, [#allocation9], %s1970_s13, %s1970_s13, %s1971_s14  }
  0x25   :  { %s1972_s26 = smov [#allocation2]   ;;  %s1973_s29 = smov [#allocation7]  }
  0x26   :  { %s23_s28 = sshll.u32 %s1972_s26, 4  ;;  %s47_s30 = sshll.u32 %s1973_s29, 4  ;;  %s24_s28 = int_to_ptr.vmem [resolvable:$true] %s23_s28  ;;  %s2057_s30 = int_to_ptr.vmem [resolvable:$true] %s47_s30 }
  0x27   :  { %s1848_s10 = scalar_lea.hbm %s2395_s0, 2048 }
  0x28   :  { %p1849_p2 = scmp.ne.s32.totalorder %s2395_s0, %s1848_s10  ;;  %p1852_p3 = scmp.lt.u32.totalorder %s1848_s10, %s2395_s0 }
  0x2a   :  { %p1854_p4 = pnand %p1852_p3, %p1849_p2 }
  0x2c   :  { %1857 = shalt.err (!%p1854_p4)
}
  0x2d   :  { %s1858_s3 = scalar_lea.vmem %s24_s28, 2048  ;;  %p1863_p6 = scmp.lt.s32.totalorder %s24_s28, %s24_s28 }
  0x2e   :  { %p1859_p5 = scmp.ne.s32.totalorder %s24_s28, %s1858_s3  ;;  %p1864_p7 = scmp.lt.s32.totalorder %s1858_s3, %s1858_s3 }
  0x30   :  { %p1865_p8 = por %p1864_p7, %p1863_p6 }
  0x32   :  { %p1866_p9 = pnand %p1865_p8, %p1859_p5 }
  0x34   :  { %1869 = shalt.err (!%p1866_p9)
}
  0x35   :  { %29 = dma.hbm_to_vmem [thread:$0]  %s2395_s0, 2048, %s24_s28, [#allocation3], %s1970_s13, %s1970_s13, %s1971_s14  }
  0x36   :  { %s1870_s20 = scalar_lea.hbm %s2397_s2, 4096 }
  0x37   :  { %p1871_p10 = scmp.ne.s32.totalorder %s2397_s2, %s1870_s20  ;;  %p1874_p11 = scmp.lt.u32.totalorder %s1870_s20, %s2397_s2 }
  0x39   :  { %p1876_p12 = pnand %p1874_p11, %p1871_p10 }
  0x3b   :  { %1879 = shalt.err (!%p1876_p12)
}
  0x3c   :  { %s1880_s1 = scalar_lea.vmem %s2057_s30, 4096  ;;  %p1885_p0 = scmp.lt.s32.totalorder %s2057_s30, %s2057_s30 }
  0x3d   :  { %p1881_p13 = scmp.ne.s32.totalorder %s2057_s30, %s1880_s1  ;;  %p1886_p1 = scmp.lt.s32.totalorder %s1880_s1, %s1880_s1 }
  0x3f   :  { %p1887_p2 = por %p1886_p1, %p1885_p0 }
  0x41   :  { %p1888_p3 = pnand %p1887_p2, %p1881_p13 }
  0x43   :  { %1891 = shalt.err (!%p1888_p3)
}
  0x44   :  { %s1974_s0 = smov 256   ;;  %s1975_s25 = smov 16  }
  0x45   :  { %53 = dma.hbm_to_vmem [thread:$0]  %s2397_s2, 4096, %s2057_s30, [#allocation6], %s1974_s0, %s1974_s0, %s1975_s25  }
  0x46   :  { %s1976_s29 = smov [#allocation10]   ;;  %s1892_s11 = scalar_lea.hbm %s2400_s5, 4096 }
  0x47   :  { %s73_s8 = sshll.u32 %s1976_s29, 4  ;;  %p1893_p4 = scmp.ne.s32.totalorder %s2400_s5, %s1892_s11  ;;  %s74_s8 = int_to_ptr.vmem [resolvable:$true] %s73_s8 }
  0x48   :  { %p1896_p5 = scmp.lt.u32.totalorder %s1892_s11, %s2400_s5 }
  0x4a   :  { %p1898_p6 = pnand %p1896_p5, %p1893_p4 }
  0x4c   :  { %1901 = shalt.err (!%p1898_p6)
}
  0x4d   :  { %s1902_s27 = scalar_lea.vmem %s74_s8, 4096  ;;  %p1907_p8 = scmp.lt.s32.totalorder %s74_s8, %s74_s8 }
  0x4e   :  { %p1903_p7 = scmp.ne.s32.totalorder %s74_s8, %s1902_s27  ;;  %p1908_p9 = scmp.lt.s32.totalorder %s1902_s27, %s1902_s27 }
  0x50   :  { %p1909_p10 = por %p1908_p9, %p1907_p8 }
  0x52   :  { %p1910_p11 = pnand %p1909_p10, %p1903_p7 }
  0x54   :  { %1913 = shalt.err (!%p1910_p11)
}
  0x55   :  { %79 = dma.hbm_to_vmem [thread:$0]  %s2400_s5, 4096, %s74_s8, [#allocation9], %s1974_s0, %s1974_s0, %s1975_s25  }
  0x56   :  { %1958 = dma.done.wait [#allocation3], 2048  }
  0x57   :  { %1959 = vsyncadd [#allocation3], 4294965248 }
  0x58   :  { %1960 = dma.done.wait [#allocation6], 6144  }
  0x59   :  { %1961 = vsyncadd [#allocation6], 4294961152 }
  0x5a   :  { %1962 = dma.done.wait [#allocation9], 6144  }
  0x5b   :  { %1963 = vsyncadd [#allocation9], 4294961152  ;;  %v111_v0 = vld [vmem:[#allocation5] sm:$0xff]  ;;  %v2109_v1 = vld [vmem:[#allocation5 + $0x8] sm:$0xff] }
  0x5c   :  { %v2111_v2 = vld [vmem:[#allocation5 + $0x10] sm:$0xff]  ;;  %v1600_v3 = vpack.c.bf16 %v2109_v1, %v111_v0  ;;  %v2114_v4 = vld [vmem:[#allocation5 + $0x18] sm:$0xff]  ;;  %1464 = vmatprep.mubr.f32.mxu0 %v111_v0  ;;  %v2118_v6 = vld [vmem:[#allocation5 + $0x20] sm:$0xff] }
  0x5d   :  { %v1604_v5 = vpack.c.bf16 %v2114_v4, %v2111_v2  ;;  %v2120_v7 = vld [vmem:[#allocation5 + $0x28] sm:$0xff]  ;;  %v2124_v9 = vld [vmem:[#allocation2] sm:$0xff]  ;;  %v2126_v10 = vld [vmem:[#allocation5 + $0x30] sm:$0xff] }
  0x5e   :  { %1601 = vmatprep.subr.bf16.mxu1 %v1600_v3  ;;  %v1608_v8 = vpack.c.bf16 %v2120_v7, %v2118_v6  ;;  %v2128_v11 = vld [vmem:[#allocation5 + $0x38] sm:$0xff]  ;;  %1408 = vmatprep.mubr.f32.mxu1 %v2124_v9  ;;  %v2133_v13 = vld [vmem:[#allocation5 + $0x40] sm:$0xff]  ;;  %v2135_v14 = vld [vmem:[#allocation5 + $0x48] sm:$0xff] }
  0x5f   :  { %1603 = vmatpush3.bf16.msra.mxu1 %v1600_v3  ;;  %v1612_v12 = vpack.c.bf16 %v2128_v11, %v2126_v10  ;;  %v465_v15 = vld [vmem:[#allocation8] sm:$0xff]  ;;  %v466_v16 = vld [vmem:[#allocation8 + $0x8] sm:$0xff]  ;;  %v467_v18 = vld [vmem:[#allocation8 + $0x10] sm:$0xff]  ;;  %v1616_v19 = vpack.c.bf16 %v2135_v14, %v2133_v13 }
  0x60   :  { %1605 = vmatprep.subr.bf16.mxu1 %v1604_v5  ;;  %v1664_v17 = vpack.c.bf16 %v466_v16, %v465_v15  ;;  %v468_v20 = vld [vmem:[#allocation8 + $0x18] sm:$0xff]  ;;  %v2139_v21 = vld [vmem:[#allocation5 + $0x50] sm:$0xff]  ;;  %v469_v24 = vld [vmem:[#allocation8 + $0x20] sm:$0xff] }
  0x61   :  { %v2141_v22 = vld [vmem:[#allocation5 + $0x58] sm:$0xff]  ;;  %v1668_v23 = vpack.c.bf16 %v468_v20, %v467_v18  ;;  %v470_v25 = vld [vmem:[#allocation8 + $0x28] sm:$0xff]  ;;  %v471_v28 = vld [vmem:[#allocation8 + $0x30] sm:$0xff] }
  0x62   :  { %1665 = vmatprep.subr.bf16.mxu0 %v1664_v17  ;;  %v1672_v26 = vpack.c.bf16 %v470_v25, %v469_v24  ;;  %v1620_v27 = vpack.c.bf16 %v2141_v22, %v2139_v21  ;;  %v472_v29 = vld [vmem:[#allocation8 + $0x38] sm:$0xff]  ;;  %v2145_v30 = vld [vmem:[#allocation5 + $0x60] sm:$0xff]  ;;  %v2147_v31 = vld [vmem:[#allocation5 + $0x68] sm:$0xff] }
  0x63   :  { %1607 = vmatpush3.bf16.msra.mxu1 %v1604_v5  ;;  %1667 = vmatpush3.bf16.msra.mxu0 %v1664_v17  ;;  %v1676_v32 = vpack.c.bf16 %v472_v29, %v471_v28  ;;  %v1624_v33 = vpack.c.bf16 %v2147_v31, %v2145_v30  ;;  %v473_v34 = vld [vmem:[#allocation8 + $0x40] sm:$0xff]  ;;  %v474_v35 = vld [vmem:[#allocation8 + $0x48] sm:$0xff]  ;;  %v2151_v36 = vld [vmem:[#allocation5 + $0x70] sm:$0xff] }
  0x64   :  { %1609 = vmatprep.subr.bf16.mxu1 %v1608_v8  ;;  %1669 = vmatprep.subr.bf16.mxu0 %v1668_v23  ;;  %v2153_v37 = vld [vmem:[#allocation5 + $0x78] sm:$0xff]  ;;  %v1680_v38 = vpack.c.bf16 %v474_v35, %v473_v34  ;;  %v475_v40 = vld [vmem:[#allocation8 + $0x50] sm:$0xff]  ;;  %v273_v42 = vld [vmem:[#allocation7 + $0x8] sm:$0xff] }
  0x65   :  { %v1628_v39 = vpack.c.bf16 %v2153_v37, %v2151_v36  ;;  %v476_v41 = vld [vmem:[#allocation8 + $0x58] sm:$0xff]  ;;  %v272_v46 = vld [vmem:[#allocation7] sm:$0xff]  ;;  %v274_v47 = vld [vmem:[#allocation7 + $0x10] sm:$0xff] }
  0x66   :  { %v275_v43 = vld [vmem:[#allocation7 + $0x18] sm:$0xff]  ;;  %v1684_v44 = vpack.c.bf16 %v476_v41, %v475_v40  ;;  %v277_v48 = vld [vmem:[#allocation7 + $0x28] sm:$0xff]  ;;  %v477_v50 = vld [vmem:[#allocation8 + $0x60] sm:$0xff]  ;;  %v1634_v54 = vpack.c.bf16 %v274_v47, %v272_v46 }
  0x67   :  { %1611 = vmatpush3.bf16.msra.mxu1 %v1608_v8  ;;  %1671 = vmatpush3.bf16.msra.mxu0 %v1668_v23  ;;  %v1632_v45 = vpack.c.bf16 %v275_v43, %v273_v42  ;;  %v279_v49 = vld [vmem:[#allocation7 + $0x38] sm:$0xff]  ;;  %v478_v51 = vld [vmem:[#allocation8 + $0x68] sm:$0xff]  ;;  %v2159_v53 = vld [vmem:[#allocation2 + $0x10] sm:$0xff] }
  0x68   :  { %1613 = vmatprep.subr.bf16.mxu1 %v1612_v12  ;;  %1673 = vmatprep.subr.bf16.mxu0 %v1672_v26  ;;  %v2157_v52 = vld [vmem:[#allocation2 + $0x8] sm:$0xff]  ;;  %v1636_v55 = vpack.c.bf16 %v279_v49, %v277_v48  ;;  %v276_v56 = vld [vmem:[#allocation7 + $0x20] sm:$0xff]  ;;  %v278_v57 = vld [vmem:[#allocation7 + $0x30] sm:$0xff]  ;;  %v1688_v59 = vpack.c.bf16 %v478_v51, %v477_v50 }
  0x69   :  { %v281_v58 = vld [vmem:[#allocation7 + $0x48] sm:$0xff]  ;;  %v283_v60 = vld [vmem:[#allocation7 + $0x58] sm:$0xff]  ;;  %v479_v61 = vld [vmem:[#allocation8 + $0x70] sm:$0xff]  ;;  %v1638_v0 = vpack.c.bf16 %v278_v57, %v276_v56 }
  0x6a   :  { %v480_v62 = vld [vmem:[#allocation8 + $0x78] sm:$0xff]  ;;  %v2165_v3 = vld [vmem:[#allocation2 + $0x20] sm:$0xff]  ;;  %v1640_v5 = vpack.c.bf16 %v283_v60, %v281_v58  ;;  %v285_v16 = vld [vmem:[#allocation7 + $0x68] sm:$0xff] }
  0x6b   :  { %1615 = vmatpush3.bf16.msra.mxu1 %v1612_v12  ;;  %1675 = vmatpush3.bf16.msra.mxu0 %v1672_v26  ;;  %v2163_v63 = vld [vmem:[#allocation2 + $0x18] sm:$0xff]  ;;  %v280_v8 = vld [vmem:[#allocation7 + $0x40] sm:$0xff]  ;;  %v282_v12 = vld [vmem:[#allocation7 + $0x50] sm:$0xff]  ;;  %v1692_v15 = vpack.c.bf16 %v480_v62, %v479_v61 }
  0x6c   :  { %1617 = vmatprep.subr.bf16.mxu1 %v1616_v19  ;;  %1677 = vmatprep.subr.bf16.mxu0 %v1676_v32  ;;  %v287_v17 = vld [vmem:[#allocation7 + $0x78] sm:$0xff]  ;;  %v2169_v18 = vld [vmem:[#allocation2 + $0x28] sm:$0xff]  ;;  %v2171_v20 = vld [vmem:[#allocation2 + $0x30] sm:$0xff] }
  0x6d   :  { %v1644_v23 = vpack.c.bf16 %v287_v17, %v285_v16  ;;  %v284_v24 = vld [vmem:[#allocation7 + $0x60] sm:$0xff]  ;;  %v286_v25 = vld [vmem:[#allocation7 + $0x70] sm:$0xff]  ;;  %v289_v26 = vld [vmem:[#allocation7 + $0x88] sm:$0xff] }
  0x6e   :  { %v2175_v28 = vld [vmem:[#allocation2 + $0x38] sm:$0xff]  ;;  %v1646_v29 = vpack.c.bf16 %v286_v25, %v284_v24  ;;  %v288_v34 = vld [vmem:[#allocation7 + $0x80] sm:$0xff]  ;;  %v290_v35 = vld [vmem:[#allocation7 + $0x90] sm:$0xff] }
  0x6f   :  { %1619 = vmatpush3.bf16.msra.mxu1 %v1616_v19  ;;  %1679 = vmatpush3.bf16.msra.mxu0 %v1676_v32  ;;  %v1642_v19 = vpack.c.bf16 %v282_v12, %v280_v8  ;;  %v2177_v32 = vld [vmem:[#allocation2 + $0x40] sm:$0xff]  ;;  %v2183_v40 = vld [vmem:[#allocation2 + $0x48] sm:$0xff]  ;;  %v1650_v41 = vpack.c.bf16 %v290_v35, %v288_v34  ;;  %v2185_v42 = vld [vmem:[#allocation2 + $0x50] sm:$0xff] }
  0x70   :  { %1621 = vmatprep.subr.bf16.mxu1 %v1620_v27  ;;  %1681 = vmatprep.subr.bf16.mxu0 %v1680_v38  ;;  %v297_v46 = vld [vmem:[#allocation7 + $0xc8] sm:$0xff]  ;;  %v299_v47 = vld [vmem:[#allocation7 + $0xd8] sm:$0xff]  ;;  %v2193_v48 = vld [vmem:[#allocation2 + $0x60] sm:$0xff] }
  0x71   :  { %v1656_v49 = vpack.c.bf16 %v299_v47, %v297_v46  ;;  %v296_v50 = vld [vmem:[#allocation7 + $0xc0] sm:$0xff]  ;;  %v298_v51 = vld [vmem:[#allocation7 + $0xd0] sm:$0xff] }
  0x72   :  { %v2201_v56 = vld [vmem:[#allocation2 + $0x70] sm:$0xff]  ;;  %v300_v58 = vld [vmem:[#allocation7 + $0xe0] sm:$0xff] }
  0x73   :  { %1623 = vmatpush3.bf16.msra.mxu1 %v1620_v27  ;;  %1683 = vmatpush3.bf16.msra.mxu0 %v1680_v38  ;;  %v291_v27 = vld [vmem:[#allocation7 + $0x98] sm:$0xff]  ;;  %v293_v38 = vld [vmem:[#allocation7 + $0xa8] sm:$0xff] }
  0x74   :  { %1625 = vmatprep.subr.bf16.mxu1 %v1624_v33  ;;  %1685 = vmatprep.subr.bf16.mxu0 %v1684_v44 }
  0x77   :  { %1627 = vmatpush3.bf16.msra.mxu1 %v1624_v33  ;;  %1687 = vmatpush3.bf16.msra.mxu0 %v1684_v44  ;;  %v1648_v33 = vpack.c.bf16 %v291_v27, %v289_v26  ;;  %v292_v44 = vld [vmem:[#allocation7 + $0xa0] sm:$0xff] }
  0x78   :  { %1629 = vmatprep.subr.bf16.mxu1 %v1628_v39  ;;  %1689 = vmatprep.subr.bf16.mxu0 %v1688_v59 }
  0x7b   :  { %1631 = vmatpush3.bf16.msra.mxu1 %v1628_v39  ;;  %1691 = vmatpush3.bf16.msra.mxu0 %v1688_v59  ;;  %v295_v39 = vld [vmem:[#allocation7 + $0xb8] sm:$0xff]  ;;  %v302_v59 = vld [vmem:[#allocation7 + $0xf0] sm:$0xff] }
  0x7c   :  { %1633 = vmatprep.subr.bf16.mxu1 %v1632_v45  ;;  %1693 = vmatprep.subr.bf16.mxu0 %v1692_v15  ;;  %v1652_v43 = vpack.c.bf16 %v295_v39, %v293_v38  ;;  %v294_v45 = vld [vmem:[#allocation7 + $0xb0] sm:$0xff] }
  0x7e   :  { %1409 = vmatmul.mubr.f32.vlgmr.msra.gmra.mrb[0].mxu1 %v2157_v52 }
  0x7f   :  { %1411 = vmatprep.mubr.f32.mxu1 %v2159_v53  ;;  %1635 = vmatpush1.bf16.msra.mxu1 %v1634_v54  ;;  %v301_v54 = vld [vmem:[#allocation7 + $0xe8] sm:$0xff] }
  0x80   :  { %1637 = vmatprep.subr.bf16.mxu1 %v1636_v55  ;;  %1695 = vmatpush3.bf16.msra.mxu0 %v1692_v15  ;;  %v303_v55 = vld [vmem:[#allocation7 + $0xf8] sm:$0xff] }
  0x81   :  { %v1660_v57 = vpack.c.bf16 %v303_v55, %v301_v54 }
  0x82   :  { %1412 = vmatmul.mubr.f32.gmra.mrb[2].mxu1 %v2163_v63 }
  0x83   :  { %1414 = vmatprep.mubr.f32.mxu1 %v2165_v3  ;;  %1639 = vmatpush1.bf16.msra.mxu1 %v1638_v0 }
  0x84   :  { %1641 = vmatprep.subr.bf16.mxu1 %v1640_v5  ;;  %1465 = vmatmul.mubr.f32.vlgmr.msra.gmra.mrb[0].mxu0 %v2109_v1  ;;  %v2191_v1 = vld [vmem:[#allocation2 + $0x58] sm:$0xff] }
  0x85   :  { %1467 = vmatprep.mubr.f32.mxu0 %v2111_v2  ;;  %v1654_v2 = vpack.c.bf16 %v294_v45, %v292_v44 }
  0x86   :  { %1415 = vmatmul.mubr.f32.gmra.mrb[4].mxu1 %v2169_v18 }
  0x87   :  { %1417 = vmatprep.mubr.f32.mxu1 %v2171_v20  ;;  %1643 = vmatpush1.bf16.msra.mxu1 %v1642_v19 }
  0x88   :  { %1645 = vmatprep.subr.bf16.mxu1 %v1644_v23  ;;  %1468 = vmatmul.mubr.f32.gmra.mrb[2].mxu0 %v2114_v4  ;;  %v2199_v4 = vld [vmem:[#allocation2 + $0x68] sm:$0xff] }
  0x89   :  { %1470 = vmatprep.mubr.f32.mxu0 %v2118_v6  ;;  %v1658_v6 = vpack.c.bf16 %v298_v51, %v296_v50 }
  0x8a   :  { %1418 = vmatmul.mubr.f32.gmra.mrb[6].mxu1 %v2175_v28 }
  0x8b   :  { %1420 = vmatprep.mubr.f32.mxu1 %v2177_v32  ;;  %1647 = vmatpush1.bf16.msra.mxu1 %v1646_v29 }
  0x8c   :  { %1649 = vmatprep.subr.bf16.mxu1 %v1648_v33  ;;  %1471 = vmatmul.mubr.f32.gmra.mrb[4].mxu0 %v2120_v7  ;;  %v2207_v7 = vld [vmem:[#allocation2 + $0x78] sm:$0xff] }
  0x8d   :  { %1473 = vmatprep.mubr.f32.mxu0 %v2126_v10  ;;  %v1662_v10 = vpack.c.bf16 %v302_v59, %v300_v58 }
  0x8e   :  { %1421 = vmatmul.mubr.f32.gmra.mrb[8].mxu1 %v2183_v40 }
  0x8f   :  { %1423 = vmatprep.mubr.f32.mxu1 %v2185_v42  ;;  %1651 = vmatpush1.bf16.msra.mxu1 %v1650_v41 }
  0x90   :  { %1653 = vmatprep.subr.bf16.mxu1 %v1652_v43  ;;  %1474 = vmatmul.mubr.f32.gmra.mrb[6].mxu0 %v2128_v11  ;;  %v1977_v11 = vmov 0.0  }
  0x91   :  { %1476 = vmatprep.mubr.f32.mxu0 %v2133_v13 }
  0x92   :  { %1424 = vmatmul.mubr.f32.gmra.mrb[10].mxu1 %v2191_v1 }
  0x93   :  { %1426 = vmatprep.mubr.f32.mxu1 %v2193_v48  ;;  %1655 = vmatpush1.bf16.msra.mxu1 %v1654_v2 }
  0x94   :  { %1657 = vmatprep.subr.bf16.mxu1 %v1656_v49  ;;  %1477 = vmatmul.mubr.f32.gmra.mrb[8].mxu0 %v2135_v14 }
  0x95   :  { %1479 = vmatprep.mubr.f32.mxu0 %v2139_v21 }
  0x96   :  { %1427 = vmatmul.mubr.f32.gmra.mrb[12].mxu1 %v2199_v4 }
  0x97   :  { %1429 = vmatprep.mubr.f32.mxu1 %v2201_v56  ;;  %1659 = vmatpush1.bf16.msra.mxu1 %v1658_v6 }
  0x98   :  { %1661 = vmatprep.subr.bf16.mxu1 %v1660_v57  ;;  %1480 = vmatmul.mubr.f32.gmra.mrb[10].mxu0 %v2141_v22 }
  0x99   :  { %1482 = vmatprep.mubr.f32.mxu0 %v2145_v30 }
  0x9a   :  { %1430 = vmatmul.mubr.f32.gmra.mrb[14].mxu1 %v2207_v7 }
  0x9b   :  { %1663 = vmatpush1.bf16.msra.mxu1 %v1662_v10  ;;  %368 = vmatprep.mubr.f32.mxu1 %v1977_v11 }
  0x9c   :  { %1483 = vmatmul.mubr.f32.gmra.mrb[12].mxu0 %v2147_v31 }
  0x9d   :  { %1485 = vmatprep.mubr.f32.mxu0 %v2151_v36 }
  0xa0   :  { %1486 = vmatmul.mubr.f32.gmra.mrb[14].mxu0 %v2153_v37 }
  0xa1   :  { %1520 = vmatprep.mubr.f32.mxu0 %v2124_v9 }
 0x151   :  { %v1410_v13 = vpop.f32.mrb[0].mxu1 }
 0x152   :  { %v193_v14 = vpop.f32.mrb[1].mxu1 }
 0x153   :  { %369 = vmatmul.mubr.f32.vlgmr.msra.gmra.mrb[16].mxu1 %v193_v14 }
 0x154   :  { %374 = vmatprep.mubr.f32.mxu1 %v1977_v11 }
 0x155   :  { %v1413_v21 = vpop.f32.mrb[2].mxu1 }
 0x156   :  { %v203_v22 = vpop.f32.mrb[3].mxu1 }
 0x157   :  { %375 = vmatmul.mubr.f32.gmra.mrb[18].mxu1 %v1410_v13  ;;  %v1466_v36 = vpop.f32.mrb[0].mxu0 }
 0x158   :  { %380 = vmatprep.mubr.f32.mxu1 %v1977_v11  ;;  %v554_v60 = vpop.f32.mrb[1].mxu0 }
 0x159   :  { %v1416_v30 = vpop.f32.mrb[4].mxu1 }
 0x15a   :  { %v213_v31 = vpop.f32.mrb[5].mxu1 }
 0x15b   :  { %381 = vmatmul.mubr.f32.gmra.mrb[20].mxu1 %v203_v22  ;;  %v1469_v19 = vpop.f32.mrb[2].mxu0 }
 0x15c   :  { %386 = vmatprep.mubr.f32.mxu1 %v1977_v11  ;;  %v564_v23 = vpop.f32.mrb[3].mxu0 }
 0x15d   :  { %v1419_v37 = vpop.f32.mrb[6].mxu1 }
 0x15e   :  { %v223_v61 = vpop.f32.mrb[7].mxu1 }
 0x15f   :  { %387 = vmatmul.mubr.f32.gmra.mrb[22].mxu1 %v1413_v21  ;;  %v1472_v24 = vpop.f32.mrb[4].mxu0 }
 0x160   :  { %392 = vmatprep.mubr.f32.mxu1 %v1977_v11  ;;  %v574_v25 = vpop.f32.mrb[5].mxu0 }
 0x161   :  { %v1422_v62 = vpop.f32.mrb[8].mxu1 }
 0x162   :  { %v233_v0 = vpop.f32.mrb[9].mxu1 }
 0x163   :  { %393 = vmatmul.mubr.f32.gmra.mrb[24].mxu1 %v213_v31  ;;  %v1475_v26 = vpop.f32.mrb[6].mxu0 }
 0x164   :  { %398 = vmatprep.mubr.f32.mxu1 %v1977_v11  ;;  %v584_v27 = vpop.f32.mrb[7].mxu0 }
 0x165   :  { %v1425_v5 = vpop.f32.mrb[10].mxu1 }
 0x166   :  { %v243_v8 = vpop.f32.mrb[11].mxu1 }
 0x167   :  { %399 = vmatmul.mubr.f32.gmra.mrb[26].mxu1 %v1416_v30  ;;  %v1478_v29 = vpop.f32.mrb[8].mxu0 }
 0x168   :  { %404 = vmatprep.mubr.f32.mxu1 %v1977_v11  ;;  %v594_v33 = vpop.f32.mrb[9].mxu0 }
 0x169   :  { %v1428_v12 = vpop.f32.mrb[12].mxu1 }
 0x16a   :  { %v253_v15 = vpop.f32.mrb[13].mxu1 }
 0x16b   :  { %405 = vmatmul.mubr.f32.gmra.mrb[28].mxu1 %v223_v61  ;;  %v2235_v34 = vpop.f32.mrb[10].mxu0 }
 0x16c   :  { %410 = vmatprep.mubr.f32.mxu1 %v1977_v11  ;;  %v604_v35 = vpop.f32.mrb[11].mxu0 }
 0x16d   :  { %v1431_v16 = vpop.f32.mrb[14].mxu1 }
 0x16e   :  { %v263_v17 = vpop.f32.mrb[15].mxu1 }
 0x16f   :  { %411 = vmatmul.mubr.f32.gmra.mrb[30].mxu1 %v1419_v37  ;;  %v2237_v38 = vpop.f32.mrb[12].mxu0 }
 0x170   :  { %416 = vmatprep.mubr.f32.mxu1 %v1977_v11  ;;  %v2239_v39 = vpop.f32.mrb[13].mxu0 }
 0x173   :  { %417 = vmatmul.mubr.f32.gmra.mrb[32].mxu1 %v233_v0  ;;  %v2241_v41 = vpop.f32.mrb[14].mxu0 }
 0x174   :  { %422 = vmatprep.mubr.f32.mxu1 %v1977_v11  ;;  %v2243_v43 = vpop.f32.mrb[15].mxu0 }
 0x177   :  { %423 = vmatmul.mubr.f32.gmra.mrb[34].mxu1 %v1422_v62 }
 0x178   :  { %428 = vmatprep.mubr.f32.mxu1 %v1977_v11 }
 0x17b   :  { %429 = vmatmul.mubr.f32.gmra.mrb[36].mxu1 %v243_v8 }
 0x17c   :  { %434 = vmatprep.mubr.f32.mxu1 %v1977_v11 }
 0x17f   :  { %435 = vmatmul.mubr.f32.gmra.mrb[38].mxu1 %v1425_v5 }
 0x180   :  { %440 = vmatprep.mubr.f32.mxu1 %v1977_v11 }
 0x183   :  { %441 = vmatmul.mubr.f32.gmra.mrb[40].mxu1 %v253_v15 }
 0x184   :  { %446 = vmatprep.mubr.f32.mxu1 %v1977_v11 }
 0x187   :  { %447 = vmatmul.mubr.f32.gmra.mrb[42].mxu1 %v1428_v12 }
 0x188   :  { %452 = vmatprep.mubr.f32.mxu1 %v1977_v11 }
 0x18b   :  { %453 = vmatmul.mubr.f32.gmra.mrb[44].mxu1 %v263_v17 }
 0x18c   :  { %458 = vmatprep.mubr.f32.mxu1 %v1977_v11 }
 0x18f   :  { %459 = vmatmul.mubr.f32.gmra.mrb[46].mxu1 %v1431_v16 }
 0x190   :  { %1576 = vmatprep.mubr.f32.mxu1 %v2124_v9  ;;  %v2248_v9 = vld [vmem:[%s2399_s4] ss:$0 sm:$0xff]  ;;  %s1978_s4 = smov [#allocation12]  }
 0x191   :  { %v555_v44 = vadd.f32 %v2248_v9, %v554_v60  ;;  %v560_v46 = vadd.f32 %v1466_v36, %v2248_v9  ;;  %v565_v54 = vadd.f32 %v2248_v9, %v564_v23  ;;  %v570_v57 = vadd.f32 %v1469_v19, %v2248_v9  ;;  %s1229_s18 = sshll.u32 %s1978_s4, 4  ;;  %s1230_s18 = int_to_ptr.vmem [resolvable:$true] %s1229_s18 }
 0x192   :  { %v575_v21 = vadd.f32 %v2248_v9, %v574_v25  ;;  %v580_v31 = vadd.f32 %v1472_v24, %v2248_v9  ;;  %v585_v0 = vadd.f32 %v2248_v9, %v584_v27  ;;  %v590_v12 = vadd.f32 %v1475_v26, %v2248_v9  ;;  %s1914_s19 = scalar_lea.vmem %s1230_s18, 2048  ;;  %p1919_p13 = scmp.lt.s32.totalorder %s1230_s18, %s1230_s18 }
 0x193   :  { %v595_v24 = vadd.f32 %v2248_v9, %v594_v33  ;;  %v600_v27 = vadd.f32 %v1478_v29, %v2248_v9  ;;  %v610_v33 = vadd.f32 %v2235_v34, %v2248_v9  ;;  %p1915_p12 = scmp.ne.s32.totalorder %s1230_s18, %s1914_s19  ;;  %p1920_p0 = scmp.lt.s32.totalorder %s1914_s19, %s1914_s19 }
 0x195   :  { %p1921_p1 = por %p1920_p0, %p1919_p13 }
 0x197   :  { %p1922_p2 = pnand %p1921_p1, %p1915_p12 }
 0x226   :  { %v370_v45 = vpop.f32.mrb[16].mxu1 }
 0x227   :  { %v2252_v47 = vadd.f32 %v555_v44, %v370_v45  ;;  %v372_v2 = vpop.f32.mrb[17].mxu1 }
 0x22a   :  { %v376_v49 = vpop.f32.mrb[18].mxu1 }
 0x22b   :  { %v2254_v50 = vadd.f32 %v560_v46, %v376_v49  ;;  %v378_v51 = vpop.f32.mrb[19].mxu1 }
 0x22c   :  { %v1696_v55 = vpack.c.bf16 %v378_v51, %v372_v2  ;;  %v605_v51 = vadd.f32 %v2248_v9, %v604_v35  ;;  %v620_v35 = vadd.f32 %v2237_v38, %v2248_v9 }
 0x22e   :  { %v382_v6 = vpop.f32.mrb[20].mxu1  ;;  %1697 = vmatprep.subr.bf16.mxu0 %v1696_v55 }
 0x22f   :  { %v2258_v58 = vadd.f32 %v565_v54, %v382_v6  ;;  %v384_v59 = vpop.f32.mrb[21].mxu1  ;;  %1699 = vmatpush3.bf16.msra.mxu0 %v1696_v55 }
 0x232   :  { %v388_v10 = vpop.f32.mrb[22].mxu1 }
 0x233   :  { %v2260_v13 = vadd.f32 %v570_v57, %v388_v10  ;;  %v390_v14 = vpop.f32.mrb[23].mxu1 }
 0x234   :  { %v1700_v22 = vpack.c.bf16 %v390_v14, %v384_v59  ;;  %v615_v14 = vadd.f32 %v2248_v9, %v2239_v39  ;;  %v630_v39 = vadd.f32 %v2241_v41, %v2248_v9  ;;  %v988_v41 = vld [vmem:[#allocation10 + $0x8] sm:$0xff] }
 0x236   :  { %v394_v30 = vpop.f32.mrb[24].mxu1  ;;  %1701 = vmatprep.subr.bf16.mxu0 %v1700_v22 }
 0x237   :  { %v2264_v36 = vadd.f32 %v575_v21, %v394_v30  ;;  %v396_v37 = vpop.f32.mrb[25].mxu1  ;;  %1703 = vmatpush3.bf16.msra.mxu0 %v1700_v22 }
 0x23a   :  { %v400_v60 = vpop.f32.mrb[26].mxu1 }
 0x23b   :  { %v2266_v61 = vadd.f32 %v580_v31, %v400_v60  ;;  %v402_v62 = vpop.f32.mrb[27].mxu1 }
 0x23c   :  { %v1704_v5 = vpack.c.bf16 %v402_v62, %v396_v37  ;;  %v625_v62 = vadd.f32 %v2248_v9, %v2243_v43  ;;  %v990_v43 = vld [vmem:[#allocation10 + $0x18] sm:$0xff]  ;;  %v987_v9 = vld [vmem:[#allocation10] sm:$0xff] }
 0x23e   :  { %v406_v8 = vpop.f32.mrb[28].mxu1  ;;  %1705 = vmatprep.subr.bf16.mxu0 %v1704_v5 }
 0x23f   :  { %v2270_v15 = vadd.f32 %v585_v0, %v406_v8  ;;  %v408_v16 = vpop.f32.mrb[29].mxu1  ;;  %1707 = vmatpush3.bf16.msra.mxu0 %v1704_v5 }
 0x242   :  { %v412_v17 = vpop.f32.mrb[30].mxu1 }
 0x243   :  { %v2272_v19 = vadd.f32 %v590_v12, %v412_v17  ;;  %v414_v23 = vpop.f32.mrb[31].mxu1 }
 0x244   :  { %v1708_v25 = vpack.c.bf16 %v414_v23, %v408_v16 }
 0x246   :  { %v418_v44 = vpop.f32.mrb[32].mxu1  ;;  %1709 = vmatprep.subr.bf16.mxu0 %v1708_v25 }
 0x247   :  { %v2276_v45 = vadd.f32 %v595_v24, %v418_v44  ;;  %v420_v46 = vpop.f32.mrb[33].mxu1  ;;  %1711 = vmatpush3.bf16.msra.mxu0 %v1708_v25  ;;  %v1760_v24 = vpack.c.bf16 %v990_v43, %v988_v41  ;;  %v989_v25 = vld [vmem:[#allocation10 + $0x10] sm:$0xff]  ;;  %v992_v44 = vld [vmem:[#allocation10 + $0x28] sm:$0xff]  ;;  %v1007_v43 = vld [vmem:[#allocation10 + $0xa0] sm:$0xff] }
 0x24a   :  { %v424_v26 = vpop.f32.mrb[34].mxu1 }
 0x24b   :  { %v2278_v2 = vadd.f32 %v600_v27, %v424_v26  ;;  %v426_v49 = vpop.f32.mrb[35].mxu1  ;;  %v994_v27 = vld [vmem:[#allocation10 + $0x38] sm:$0xff] }
 0x24c   :  { %v1712_v54 = vpack.c.bf16 %v426_v49, %v420_v46  ;;  %v1762_v46 = vpack.c.bf16 %v989_v25, %v987_v9  ;;  %v1764_v26 = vpack.c.bf16 %v994_v27, %v992_v44  ;;  %v991_v49 = vld [vmem:[#allocation10 + $0x20] sm:$0xff]  ;;  %v1009_v9 = vld [vmem:[#allocation10 + $0xb0] sm:$0xff]  ;;  %v1014_v25 = vld [vmem:[#allocation10 + $0xd8] sm:$0xff] }
 0x24d   :  { %v1782_v44 = vpack.c.bf16 %v1009_v9, %v1007_v43 }
 0x24e   :  { %v430_v55 = vpop.f32.mrb[36].mxu1  ;;  %1713 = vmatprep.subr.bf16.mxu0 %v1712_v54 }
 0x24f   :  { %v2283_v6 = vadd.f32 %v605_v51, %v430_v55  ;;  %v432_v57 = vpop.f32.mrb[37].mxu1  ;;  %1715 = vmatpush3.bf16.msra.mxu0 %v1712_v54  ;;  %v993_v51 = vld [vmem:[#allocation10 + $0x30] sm:$0xff]  ;;  %v996_v54 = vld [vmem:[#allocation10 + $0x48] sm:$0xff]  ;;  %v998_v55 = vld [vmem:[#allocation10 + $0x58] sm:$0xff] }
 0x252   :  { %v436_v29 = vpop.f32.mrb[38].mxu1 }
 0x253   :  { %v2285_v59 = vadd.f32 %v610_v33, %v436_v29  ;;  %v438_v10 = vpop.f32.mrb[39].mxu1  ;;  %v1766_v33 = vpack.c.bf16 %v993_v51, %v991_v49  ;;  %v995_v29 = vld [vmem:[#allocation10 + $0x40] sm:$0xff]  ;;  %v1016_v49 = vld [vmem:[#allocation10 + $0xe8] sm:$0xff]  ;;  %v1018_v51 = vld [vmem:[#allocation10 + $0xf8] sm:$0xff] }
 0x254   :  { %v1716_v21 = vpack.c.bf16 %v438_v10, %v432_v57  ;;  %v1768_v57 = vpack.c.bf16 %v998_v55, %v996_v54  ;;  %v997_v10 = vld [vmem:[#allocation10 + $0x50] sm:$0xff]  ;;  %v1788_v55 = vpack.c.bf16 %v1018_v51, %v1016_v49 }
 0x256   :  { %v442_v22 = vpop.f32.mrb[40].mxu1  ;;  %1717 = vmatprep.subr.bf16.mxu0 %v1716_v21 }
 0x257   :  { %v2291_v30 = vadd.f32 %v615_v14, %v442_v22  ;;  %v444_v34 = vpop.f32.mrb[41].mxu1  ;;  %1719 = vmatpush3.bf16.msra.mxu0 %v1716_v21  ;;  %v1000_v14 = vld [vmem:[#allocation10 + $0x68] sm:$0xff]  ;;  %v1002_v21 = vld [vmem:[#allocation10 + $0x78] sm:$0xff]  ;;  %v1770_v22 = vpack.c.bf16 %v997_v10, %v995_v29 }
 0x25a   :  { %v448_v31 = vpop.f32.mrb[42].mxu1 }
 0x25b   :  { %v2293_v37 = vadd.f32 %v620_v35, %v448_v31  ;;  %v450_v60 = vpop.f32.mrb[43].mxu1  ;;  %v1772_v35 = vpack.c.bf16 %v1002_v21, %v1000_v14  ;;  %v1001_v31 = vld [vmem:[#allocation10 + $0x70] sm:$0xff] }
 0x25c   :  { %v1720_v0 = vpack.c.bf16 %v450_v60, %v444_v34  ;;  %v999_v34 = vld [vmem:[#allocation10 + $0x60] sm:$0xff]  ;;  %v1004_v60 = vld [vmem:[#allocation10 + $0x88] sm:$0xff] }
 0x25e   :  { %v454_v5 = vpop.f32.mrb[44].mxu1  ;;  %1721 = vmatprep.subr.bf16.mxu0 %v1720_v0 }
 0x25f   :  { %v2299_v8 = vadd.f32 %v625_v62, %v454_v5  ;;  %v456_v38 = vpop.f32.mrb[45].mxu1  ;;  %1723 = vmatpush3.bf16.msra.mxu0 %v1720_v0  ;;  %v1006_v62 = vld [vmem:[#allocation10 + $0x98] sm:$0xff]  ;;  %v1774_v0 = vpack.c.bf16 %v1001_v31, %v999_v34 }
 0x260   :  { %v1776_v5 = vpack.c.bf16 %v1006_v62, %v1004_v60 }
 0x262   :  { %v460_v12 = vpop.f32.mrb[46].mxu1 }
 0x263   :  { %v2301_v16 = vadd.f32 %v630_v39, %v460_v12  ;;  %v462_v17 = vpop.f32.mrb[47].mxu1  ;;  %v1003_v39 = vld [vmem:[#allocation10 + $0x80] sm:$0xff]  ;;  %v1008_v12 = vld [vmem:[#allocation10 + $0xa8] sm:$0xff] }
 0x264   :  { %v1724_v23 = vpack.c.bf16 %v462_v17, %v456_v38  ;;  %v1005_v38 = vld [vmem:[#allocation10 + $0x90] sm:$0xff]  ;;  %v1010_v17 = vld [vmem:[#allocation10 + $0xb8] sm:$0xff] }
 0x265   :  { %v1780_v41 = vpack.c.bf16 %v1010_v17, %v1008_v12 }
 0x266   :  { %1725 = vmatprep.subr.bf16.mxu0 %v1724_v23 }
 0x267   :  { %1727 = vmatpush3.bf16.msra.mxu0 %v1724_v23  ;;  %v1778_v23 = vpack.c.bf16 %v1005_v38, %v1003_v39 }
 0x268   :  { %1761 = vmatprep.subr.bf16.mxu0 %v1760_v24  ;;  %v1012_v24 = vld [vmem:[#allocation10 + $0xc8] sm:$0xff] }
 0x269   :  { %v1784_v27 = vpack.c.bf16 %v1014_v25, %v1012_v24 }
 0x26a   :  { %1521 = vmatmul.mubr.f32.vlgmr.msra.gmra.mrb[16].mxu0 %v2157_v52 }
 0x26b   :  { %1523 = vmatprep.mubr.f32.mxu0 %v2159_v53  ;;  %1763 = vmatpush1.bf16.msra.mxu0 %v1762_v46  ;;  %v1011_v46 = vld [vmem:[#allocation10 + $0xc0] sm:$0xff] }
 0x26c   :  { %1765 = vmatprep.subr.bf16.mxu0 %v1764_v26  ;;  %v1013_v26 = vld [vmem:[#allocation10 + $0xd0] sm:$0xff] }
 0x26d   :  { %v1786_v54 = vpack.c.bf16 %v1013_v26, %v1011_v46 }
 0x26e   :  { %1524 = vmatmul.mubr.f32.gmra.mrb[18].mxu0 %v2163_v63 }
 0x26f   :  { %1526 = vmatprep.mubr.f32.mxu0 %v2165_v3  ;;  %1767 = vmatpush1.bf16.msra.mxu0 %v1766_v33  ;;  %v1015_v33 = vld [vmem:[#allocation10 + $0xe0] sm:$0xff] }
 0x270   :  { %1769 = vmatprep.subr.bf16.mxu0 %v1768_v57  ;;  %v1017_v57 = vld [vmem:[#allocation10 + $0xf0] sm:$0xff] }
 0x271   :  { %v1790_v29 = vpack.c.bf16 %v1017_v57, %v1015_v33 }
 0x272   :  { %1527 = vmatmul.mubr.f32.gmra.mrb[20].mxu0 %v2169_v18 }
 0x273   :  { %1529 = vmatprep.mubr.f32.mxu0 %v2171_v20  ;;  %1771 = vmatpush1.bf16.msra.mxu0 %v1770_v22 }
 0x274   :  { %1773 = vmatprep.subr.bf16.mxu0 %v1772_v35 }
 0x276   :  { %1530 = vmatmul.mubr.f32.gmra.mrb[22].mxu0 %v2175_v28 }
 0x277   :  { %1532 = vmatprep.mubr.f32.mxu0 %v2177_v32  ;;  %1775 = vmatpush1.bf16.msra.mxu0 %v1774_v0 }
 0x278   :  { %1777 = vmatprep.subr.bf16.mxu0 %v1776_v5 }
 0x27a   :  { %1533 = vmatmul.mubr.f32.gmra.mrb[24].mxu0 %v2183_v40 }
 0x27b   :  { %1535 = vmatprep.mubr.f32.mxu0 %v2185_v42  ;;  %1779 = vmatpush1.bf16.msra.mxu0 %v1778_v23 }
 0x27c   :  { %1781 = vmatprep.subr.bf16.mxu0 %v1780_v41 }
 0x27e   :  { %1536 = vmatmul.mubr.f32.gmra.mrb[26].mxu0 %v2191_v1 }
 0x27f   :  { %1538 = vmatprep.mubr.f32.mxu0 %v2193_v48  ;;  %1783 = vmatpush1.bf16.msra.mxu0 %v1782_v44 }
 0x280   :  { %1785 = vmatprep.subr.bf16.mxu0 %v1784_v27 }
 0x282   :  { %1539 = vmatmul.mubr.f32.gmra.mrb[28].mxu0 %v2199_v4 }
 0x283   :  { %1541 = vmatprep.mubr.f32.mxu0 %v2201_v56  ;;  %1787 = vmatpush1.bf16.msra.mxu0 %v1786_v54 }
 0x284   :  { %1789 = vmatprep.subr.bf16.mxu0 %v1788_v55 }
 0x286   :  { %1542 = vmatmul.mubr.f32.gmra.mrb[30].mxu0 %v2207_v7 }
 0x287   :  { %1083 = vmatprep.mubr.f32.mxu0 %v1977_v11  ;;  %1791 = vmatpush1.bf16.msra.mxu0 %v1790_v29 }
 0x33d   :  { %v1522_v10 = vpop.f32.mrb[16].mxu0 }
 0x33e   :  { %v795_v14 = vadd.f32 %v1522_v10, %v2254_v50  ;;  %v715_v21 = vpop.f32.mrb[17].mxu0 }
 0x33f   :  { %v794_v22 = vadd.f32 %v715_v21, %v2252_v47 }
 0x340   :  { %v811_v35 = vmax.f32 %v795_v14, 0.0 }
 0x341   :  { %v810_v34 = vmax.f32 %v794_v22, 0.0  ;;  %v1525_v31 = vpop.f32.mrb[18].mxu0 }
 0x342   :  { %827 = vst [vmem:[#allocation12 + $0x8] sm:$0xff] %v811_v35  ;;  %v797_v60 = vadd.f32 %v1525_v31, %v2260_v13  ;;  %v725_v62 = vpop.f32.mrb[19].mxu0 }
 0x343   :  { %826 = vst [vmem:[#allocation12] sm:$0xff] %v810_v34  ;;  %v1728_v0 = vpack.c.bf16 %v811_v35, %v810_v34  ;;  %v796_v5 = vadd.f32 %v725_v62, %v2258_v58 }
 0x344   :  { %v813_v39 = vmax.f32 %v797_v60, 0.0 }
 0x345   :  { %v812_v38 = vmax.f32 %v796_v5, 0.0  ;;  %v1528_v12 = vpop.f32.mrb[20].mxu0  ;;  %1729 = vmatprep.subr.bf16.mxu1 %v1728_v0 }
 0x346   :  { %829 = vst [vmem:[#allocation12 + $0x18] sm:$0xff] %v813_v39  ;;  %v799_v50 = vadd.f32 %v1528_v12, %v2266_v61  ;;  %v735_v17 = vpop.f32.mrb[21].mxu0  ;;  %1731 = vmatpush3.bf16.msra.mxu1 %v1728_v0 }
 0x347   :  { %828 = vst [vmem:[#allocation12 + $0x10] sm:$0xff] %v812_v38  ;;  %v1732_v47 = vpack.c.bf16 %v813_v39, %v812_v38  ;;  %v798_v23 = vadd.f32 %v735_v17, %v2264_v36 }
 0x348   :  { %v815_v41 = vmax.f32 %v799_v50, 0.0 }
 0x349   :  { %v814_v13 = vmax.f32 %v798_v23, 0.0  ;;  %v1531_v43 = vpop.f32.mrb[22].mxu0  ;;  %1733 = vmatprep.subr.bf16.mxu1 %v1732_v47 }
 0x34a   :  { %831 = vst [vmem:[#allocation12 + $0x28] sm:$0xff] %v815_v41  ;;  %v801_v58 = vadd.f32 %v1531_v43, %v2272_v19  ;;  %v745_v9 = vpop.f32.mrb[23].mxu0  ;;  %1735 = vmatpush3.bf16.msra.mxu1 %v1732_v47 }
 0x34b   :  { %830 = vst [vmem:[#allocation12 + $0x20] sm:$0xff] %v814_v13  ;;  %v1736_v24 = vpack.c.bf16 %v815_v41, %v814_v13  ;;  %v800_v25 = vadd.f32 %v745_v9, %v2270_v15 }
 0x34c   :  { %v817_v61 = vmax.f32 %v801_v58, 0.0 }
 0x34d   :  { %v816_v44 = vmax.f32 %v800_v25, 0.0  ;;  %v1534_v27 = vpop.f32.mrb[24].mxu0  ;;  %1737 = vmatprep.subr.bf16.mxu1 %v1736_v24 }
 0x34e   :  { %833 = vst [vmem:[#allocation12 + $0x38] sm:$0xff] %v817_v61  ;;  %v803_v36 = vadd.f32 %v1534_v27, %v2278_v2  ;;  %v755_v46 = vpop.f32.mrb[25].mxu0  ;;  %1739 = vmatpush3.bf16.msra.mxu1 %v1736_v24 }
 0x34f   :  { %832 = vst [vmem:[#allocation12 + $0x30] sm:$0xff] %v816_v44  ;;  %v1740_v26 = vpack.c.bf16 %v817_v61, %v816_v44  ;;  %v802_v49 = vadd.f32 %v755_v46, %v2276_v45 }
 0x350   :  { %v819_v19 = vmax.f32 %v803_v36, 0.0 }
 0x351   :  { %v818_v51 = vmax.f32 %v802_v49, 0.0  ;;  %v1537_v54 = vpop.f32.mrb[26].mxu0  ;;  %1741 = vmatprep.subr.bf16.mxu1 %v1740_v26 }
 0x352   :  { %835 = vst [vmem:[#allocation12 + $0x48] sm:$0xff] %v819_v19  ;;  %v805_v15 = vadd.f32 %v1537_v54, %v2285_v59  ;;  %v765_v55 = vpop.f32.mrb[27].mxu0  ;;  %1743 = vmatpush3.bf16.msra.mxu1 %v1740_v26 }
 0x353   :  { %834 = vst [vmem:[#allocation12 + $0x40] sm:$0xff] %v818_v51  ;;  %v1744_v33 = vpack.c.bf16 %v819_v19, %v818_v51  ;;  %v804_v57 = vadd.f32 %v765_v55, %v2283_v6 }
 0x354   :  { %v821_v2 = vmax.f32 %v805_v15, 0.0 }
 0x355   :  { %v820_v29 = vmax.f32 %v804_v57, 0.0  ;;  %v1540_v10 = vpop.f32.mrb[28].mxu0  ;;  %1745 = vmatprep.subr.bf16.mxu1 %v1744_v33 }
 0x356   :  { %837 = vst [vmem:[#allocation12 + $0x58] sm:$0xff] %v821_v2  ;;  %v807_v45 = vadd.f32 %v1540_v10, %v2293_v37  ;;  %v775_v14 = vpop.f32.mrb[29].mxu0  ;;  %1747 = vmatpush3.bf16.msra.mxu1 %v1744_v33 }
 0x357   :  { %836 = vst [vmem:[#allocation12 + $0x50] sm:$0xff] %v820_v29  ;;  %v1748_v21 = vpack.c.bf16 %v821_v2, %v820_v29  ;;  %v806_v22 = vadd.f32 %v775_v14, %v2291_v30 }
 0x358   :  { %v823_v59 = vmax.f32 %v807_v45, 0.0 }
 0x359   :  { %v822_v35 = vmax.f32 %v806_v22, 0.0  ;;  %v1543_v34 = vpop.f32.mrb[30].mxu0  ;;  %1749 = vmatprep.subr.bf16.mxu1 %v1748_v21 }
 0x35a   :  { %839 = vst [vmem:[#allocation12 + $0x68] sm:$0xff] %v823_v59  ;;  %v809_v6 = vadd.f32 %v1543_v34, %v2301_v16  ;;  %v785_v31 = vpop.f32.mrb[31].mxu0  ;;  %1751 = vmatpush3.bf16.msra.mxu1 %v1748_v21 }
 0x35b   :  { %838 = vst [vmem:[#allocation12 + $0x60] sm:$0xff] %v822_v35  ;;  %v1752_v60 = vpack.c.bf16 %v823_v59, %v822_v35  ;;  %v808_v62 = vadd.f32 %v785_v31, %v2299_v8 }
 0x35c   :  { %v825_v37 = vmax.f32 %v809_v6, 0.0 }
 0x35d   :  { %v824_v0 = vmax.f32 %v808_v62, 0.0  ;;  %1753 = vmatprep.subr.bf16.mxu1 %v1752_v60 }
 0x35e   :  { %841 = vst [vmem:[#allocation12 + $0x78] sm:$0xff] %v825_v37  ;;  %1755 = vmatpush3.bf16.msra.mxu1 %v1752_v60 }
 0x35f   :  { %840 = vst [vmem:[#allocation12 + $0x70] sm:$0xff] %v824_v0  ;;  %v1756_v30 = vpack.c.bf16 %v825_v37, %v824_v0 }
 0x361   :  { %1757 = vmatprep.subr.bf16.mxu1 %v1756_v30 }
 0x362   :  { %1759 = vmatpush3.bf16.msra.mxu1 %v1756_v30 }
 0x365   :  { %1577 = vmatmul.mubr.f32.vlgmr.msra.gmra.mrb[48].mxu1 %v2157_v52 }
 0x366   :  { %1579 = vmatprep.mubr.f32.mxu1 %v2159_v53 }
 0x369   :  { %1580 = vmatmul.mubr.f32.gmra.mrb[50].mxu1 %v2163_v63 }
 0x36a   :  { %1582 = vmatprep.mubr.f32.mxu1 %v2165_v3 }
 0x36d   :  { %1583 = vmatmul.mubr.f32.gmra.mrb[52].mxu1 %v2169_v18 }
 0x36e   :  { %1585 = vmatprep.mubr.f32.mxu1 %v2171_v20 }
 0x371   :  { %1586 = vmatmul.mubr.f32.gmra.mrb[54].mxu1 %v2175_v28 }
 0x372   :  { %1588 = vmatprep.mubr.f32.mxu1 %v2177_v32 }
 0x375   :  { %1589 = vmatmul.mubr.f32.gmra.mrb[56].mxu1 %v2183_v40 }
 0x376   :  { %1591 = vmatprep.mubr.f32.mxu1 %v2185_v42 }
 0x379   :  { %1592 = vmatmul.mubr.f32.gmra.mrb[58].mxu1 %v2191_v1 }
 0x37a   :  { %1594 = vmatprep.mubr.f32.mxu1 %v2193_v48 }
 0x37d   :  { %1595 = vmatmul.mubr.f32.gmra.mrb[60].mxu1 %v2199_v4 }
 0x37e   :  { %1597 = vmatprep.mubr.f32.mxu1 %v2201_v56 }
 0x381   :  { %1598 = vmatmul.mubr.f32.gmra.mrb[62].mxu1 %v2207_v7 }
 0x438   :  { %v1578_v52 = vpop.f32.mrb[48].mxu1 }
 0x439   :  { %v908_v53 = vpop.f32.mrb[49].mxu1 }
 0x43a   :  { %1084 = vmatmul.mubr.f32.vlgmr.msra.gmra.mrb[32].mxu0 %v908_v53 }
 0x43b   :  { %1089 = vmatprep.mubr.f32.mxu0 %v1977_v11 }
 0x43c   :  { %v1581_v63 = vpop.f32.mrb[50].mxu1 }
 0x43d   :  { %v918_v3 = vpop.f32.mrb[51].mxu1 }
 0x43e   :  { %1090 = vmatmul.mubr.f32.gmra.mrb[34].mxu0 %v1578_v52 }
 0x43f   :  { %1095 = vmatprep.mubr.f32.mxu0 %v1977_v11 }
 0x440   :  { %v1584_v18 = vpop.f32.mrb[52].mxu1 }
 0x441   :  { %v928_v20 = vpop.f32.mrb[53].mxu1 }
 0x442   :  { %1096 = vmatmul.mubr.f32.gmra.mrb[36].mxu0 %v918_v3 }
 0x443   :  { %1101 = vmatprep.mubr.f32.mxu0 %v1977_v11 }
 0x444   :  { %v1587_v28 = vpop.f32.mrb[54].mxu1 }
 0x445   :  { %v938_v32 = vpop.f32.mrb[55].mxu1 }
 0x446   :  { %1102 = vmatmul.mubr.f32.gmra.mrb[38].mxu0 %v1581_v63 }
 0x447   :  { %1107 = vmatprep.mubr.f32.mxu0 %v1977_v11 }
 0x448   :  { %v1590_v40 = vpop.f32.mrb[56].mxu1 }
 0x449   :  { %v948_v42 = vpop.f32.mrb[57].mxu1 }
 0x44a   :  { %1108 = vmatmul.mubr.f32.gmra.mrb[40].mxu0 %v928_v20 }
 0x44b   :  { %1113 = vmatprep.mubr.f32.mxu0 %v1977_v11 }
 0x44c   :  { %v1593_v1 = vpop.f32.mrb[58].mxu1 }
 0x44d   :  { %v958_v48 = vpop.f32.mrb[59].mxu1 }
 0x44e   :  { %1114 = vmatmul.mubr.f32.gmra.mrb[42].mxu0 %v1584_v18 }
 0x44f   :  { %1119 = vmatprep.mubr.f32.mxu0 %v1977_v11 }
 0x450   :  { %v1596_v4 = vpop.f32.mrb[60].mxu1 }
 0x451   :  { %v968_v56 = vpop.f32.mrb[61].mxu1 }
 0x452   :  { %1120 = vmatmul.mubr.f32.gmra.mrb[44].mxu0 %v938_v32 }
 0x453   :  { %1125 = vmatprep.mubr.f32.mxu0 %v1977_v11 }
 0x454   :  { %v1599_v7 = vpop.f32.mrb[62].mxu1 }
 0x455   :  { %v978_v8 = vpop.f32.mrb[63].mxu1 }
 0x456   :  { %1126 = vmatmul.mubr.f32.gmra.mrb[46].mxu0 %v1587_v28 }
 0x457   :  { %1131 = vmatprep.mubr.f32.mxu0 %v1977_v11 }
 0x45a   :  { %1132 = vmatmul.mubr.f32.gmra.mrb[48].mxu0 %v948_v42 }
 0x45b   :  { %1137 = vmatprep.mubr.f32.mxu0 %v1977_v11 }
 0x45e   :  { %1138 = vmatmul.mubr.f32.gmra.mrb[50].mxu0 %v1590_v40 }
 0x45f   :  { %1143 = vmatprep.mubr.f32.mxu0 %v1977_v11 }
 0x462   :  { %1144 = vmatmul.mubr.f32.gmra.mrb[52].mxu0 %v958_v48 }
 0x463   :  { %1149 = vmatprep.mubr.f32.mxu0 %v1977_v11 }
 0x466   :  { %1150 = vmatmul.mubr.f32.gmra.mrb[54].mxu0 %v1593_v1 }
 0x467   :  { %1155 = vmatprep.mubr.f32.mxu0 %v1977_v11 }
 0x46a   :  { %1156 = vmatmul.mubr.f32.gmra.mrb[56].mxu0 %v968_v56 }
 0x46b   :  { %1161 = vmatprep.mubr.f32.mxu0 %v1977_v11 }
 0x46e   :  { %1162 = vmatmul.mubr.f32.gmra.mrb[58].mxu0 %v1596_v4 }
 0x46f   :  { %1167 = vmatprep.mubr.f32.mxu0 %v1977_v11 }
 0x472   :  { %1168 = vmatmul.mubr.f32.gmra.mrb[60].mxu0 %v978_v8 }
 0x473   :  { %1173 = vmatprep.mubr.f32.mxu0 %v1977_v11 }
 0x476   :  { %1174 = vmatmul.mubr.f32.gmra.mrb[62].mxu0 %v1599_v7 }
 0x477   :  { %1925 = shalt.err (!%p1922_p2)
}
 0x478   :  { %s1926_s22 = scalar_lea.hbm %s2402_s7, 2048 }
 0x479   :  { %p1927_p3 = scmp.ne.s32.totalorder %s2402_s7, %s1926_s22  ;;  %p1930_p4 = scmp.lt.u32.totalorder %s1926_s22, %s2402_s7 }
 0x47b   :  { %p1932_p5 = pnand %p1930_p4, %p1927_p3 }
 0x47d   :  { %1935 = shalt.err (!%p1932_p5)
}
 0x47e   :  { %1235 = dma.vmem_to_hbm [thread:$0]  %s1230_s18, 2048, %s2402_s7, [#allocation13], %s1970_s13, %s1970_s13, %s1971_s14  }
 0x47f   :  { %s1979_s7 = smov [#allocation11]  }
 0x480   :  { %s1217_s13 = sshll.u32 %s1979_s7, 4  ;;  %s1218_s13 = int_to_ptr.vmem [resolvable:$true] %s1217_s13 }
 0x481   :  { %s1936_s14 = scalar_lea.vmem %s1218_s13, 4096  ;;  %p1941_p7 = scmp.lt.s32.totalorder %s1218_s13, %s1218_s13 }
 0x482   :  { %p1937_p6 = scmp.ne.s32.totalorder %s1218_s13, %s1936_s14  ;;  %p1942_p8 = scmp.lt.s32.totalorder %s1936_s14, %s1936_s14 }
 0x484   :  { %p1943_p9 = por %p1942_p8, %p1941_p7 }
 0x486   :  { %p1944_p10 = pnand %p1943_p9, %p1937_p6 }
 0x50d   :  { %v1085_v11 = vpop.f32.mrb[32].mxu0 }
 0x50e   :  { %1180 = vst [vmem:[#allocation11] sm:$0xff] %v1085_v11  ;;  %v1087_v16 = vpop.f32.mrb[33].mxu0 }
 0x50f   :  { %1181 = vst [vmem:[#allocation11 + $0x8] sm:$0xff] %v1087_v16 }
 0x511   :  { %v1091_v5 = vpop.f32.mrb[34].mxu0 }
 0x512   :  { %1182 = vst [vmem:[#allocation11 + $0x10] sm:$0xff] %v1091_v5  ;;  %v1093_v39 = vpop.f32.mrb[35].mxu0 }
 0x513   :  { %1183 = vst [vmem:[#allocation11 + $0x18] sm:$0xff] %v1093_v39 }
 0x515   :  { %v1097_v38 = vpop.f32.mrb[36].mxu0 }
 0x516   :  { %1184 = vst [vmem:[#allocation11 + $0x20] sm:$0xff] %v1097_v38  ;;  %v1099_v12 = vpop.f32.mrb[37].mxu0 }
 0x517   :  { %1185 = vst [vmem:[#allocation11 + $0x28] sm:$0xff] %v1099_v12 }
 0x519   :  { %v1103_v50 = vpop.f32.mrb[38].mxu0 }
 0x51a   :  { %1186 = vst [vmem:[#allocation11 + $0x30] sm:$0xff] %v1103_v50  ;;  %v1105_v17 = vpop.f32.mrb[39].mxu0 }
 0x51b   :  { %1187 = vst [vmem:[#allocation11 + $0x38] sm:$0xff] %v1105_v17 }
 0x51d   :  { %v1109_v47 = vpop.f32.mrb[40].mxu0 }
 0x51e   :  { %1188 = vst [vmem:[#allocation11 + $0x40] sm:$0xff] %v1109_v47  ;;  %v1111_v23 = vpop.f32.mrb[41].mxu0 }
 0x51f   :  { %1189 = vst [vmem:[#allocation11 + $0x48] sm:$0xff] %v1111_v23 }
 0x521   :  { %v1115_v41 = vpop.f32.mrb[42].mxu0 }
 0x522   :  { %1190 = vst [vmem:[#allocation11 + $0x50] sm:$0xff] %v1115_v41  ;;  %v1117_v13 = vpop.f32.mrb[43].mxu0 }
 0x523   :  { %1191 = vst [vmem:[#allocation11 + $0x58] sm:$0xff] %v1117_v13 }
 0x525   :  { %v1121_v43 = vpop.f32.mrb[44].mxu0 }
 0x526   :  { %1192 = vst [vmem:[#allocation11 + $0x60] sm:$0xff] %v1121_v43  ;;  %v1123_v58 = vpop.f32.mrb[45].mxu0 }
 0x527   :  { %1193 = vst [vmem:[#allocation11 + $0x68] sm:$0xff] %v1123_v58 }
 0x529   :  { %v1127_v9 = vpop.f32.mrb[46].mxu0 }
 0x52a   :  { %1194 = vst [vmem:[#allocation11 + $0x70] sm:$0xff] %v1127_v9  ;;  %v1129_v24 = vpop.f32.mrb[47].mxu0 }
 0x52b   :  { %1195 = vst [vmem:[#allocation11 + $0x78] sm:$0xff] %v1129_v24 }
 0x52d   :  { %v1133_v25 = vpop.f32.mrb[48].mxu0 }
 0x52e   :  { %1196 = vst [vmem:[#allocation11 + $0x80] sm:$0xff] %v1133_v25  ;;  %v1135_v61 = vpop.f32.mrb[49].mxu0 }
 0x52f   :  { %1197 = vst [vmem:[#allocation11 + $0x88] sm:$0xff] %v1135_v61 }
 0x531   :  { %v1139_v44 = vpop.f32.mrb[50].mxu0 }
 0x532   :  { %1198 = vst [vmem:[#allocation11 + $0x90] sm:$0xff] %v1139_v44  ;;  %v1141_v27 = vpop.f32.mrb[51].mxu0 }
 0x533   :  { %1199 = vst [vmem:[#allocation11 + $0x98] sm:$0xff] %v1141_v27 }
 0x535   :  { %v1145_v36 = vpop.f32.mrb[52].mxu0 }
 0x536   :  { %1200 = vst [vmem:[#allocation11 + $0xa0] sm:$0xff] %v1145_v36  ;;  %v1147_v46 = vpop.f32.mrb[53].mxu0 }
 0x537   :  { %1201 = vst [vmem:[#allocation11 + $0xa8] sm:$0xff] %v1147_v46 }
 0x539   :  { %v1151_v26 = vpop.f32.mrb[54].mxu0 }
 0x53a   :  { %1202 = vst [vmem:[#allocation11 + $0xb0] sm:$0xff] %v1151_v26  ;;  %v1153_v49 = vpop.f32.mrb[55].mxu0 }
 0x53b   :  { %1203 = vst [vmem:[#allocation11 + $0xb8] sm:$0xff] %v1153_v49 }
 0x53d   :  { %v1157_v19 = vpop.f32.mrb[56].mxu0 }
 0x53e   :  { %1204 = vst [vmem:[#allocation11 + $0xc0] sm:$0xff] %v1157_v19  ;;  %v1159_v51 = vpop.f32.mrb[57].mxu0 }
 0x53f   :  { %1205 = vst [vmem:[#allocation11 + $0xc8] sm:$0xff] %v1159_v51 }
 0x541   :  { %v1163_v54 = vpop.f32.mrb[58].mxu0 }
 0x542   :  { %1206 = vst [vmem:[#allocation11 + $0xd0] sm:$0xff] %v1163_v54  ;;  %v1165_v15 = vpop.f32.mrb[59].mxu0 }
 0x543   :  { %1207 = vst [vmem:[#allocation11 + $0xd8] sm:$0xff] %v1165_v15 }
 0x545   :  { %v1169_v55 = vpop.f32.mrb[60].mxu0 }
 0x546   :  { %1208 = vst [vmem:[#allocation11 + $0xe0] sm:$0xff] %v1169_v55  ;;  %v1171_v33 = vpop.f32.mrb[61].mxu0 }
 0x547   :  { %1209 = vst [vmem:[#allocation11 + $0xe8] sm:$0xff] %v1171_v33 }
 0x549   :  { %v1175_v57 = vpop.f32.mrb[62].mxu0 }
 0x54a   :  { %1210 = vst [vmem:[#allocation11 + $0xf0] sm:$0xff] %v1175_v57  ;;  %v1177_v2 = vpop.f32.mrb[63].mxu0 }
 0x54b   :  { %1211 = vst [vmem:[#allocation11 + $0xf8] sm:$0xff] %v1177_v2 }
 0x54c   :  { %1947 = shalt.err (!%p1944_p10)
}
 0x54d   :  { %s1948_s10 = scalar_lea.hbm %s2401_s6, 4096 }
 0x54e   :  { %p1949_p11 = scmp.ne.s32.totalorder %s2401_s6, %s1948_s10  ;;  %p1952_p12 = scmp.lt.u32.totalorder %s1948_s10, %s2401_s6 }
 0x550   :  { %p1954_p13 = pnand %p1952_p12, %p1949_p11 }
 0x552   :  { %1957 = shalt.err (!%p1954_p13)
}
 0x553   :  { %1223 = dma.vmem_to_hbm [thread:$0]  %s1218_s13, 4096, %s2401_s6, [#allocation4], %s1974_s0, %s1974_s0, %s1975_s25  }
 0x554   :  { %1964 = dma.done.wait [#allocation4], 4096  }
 0x555   :  { %1965 = vsyncadd [#allocation4], 4294963200 }
 0x556   :  { %1966 = dma.done.wait [#allocation13], 2048  }
 0x557   :  { %1967 = vsyncadd [#allocation13], 4294965248 }
 0x558   :  { %1242 = vsyncpa [#allocation3], 1 }
 0x559   :  { %1243 = vsyncpa [#allocation6], 1 }
 0x55a   :  { %1244 = vsyncpa [#allocation9], 1 }
 0x55b   :  { %1245 = vsyncpa [#allocation4], 1 }
 0x55c   :  { %1246 = vsyncpa [#allocation13], 1 }

</bundles_post_ra>
